<compile_context>
chip_gen: v7x
topology: tpu7x:2x2x1
jax: 0.10.0
libtpu: 0.0.40
codegen_flags: <defaults>
</compile_context>

<pallas_src>
import math

import jax
import jax.numpy as jnp
from jax import lax
from jax.experimental import pallas as pl
from jax.experimental.pallas import tpu as pltpu


def _flash_attn_kernel(q_ref, k_ref, v_ref, am_ref, kl_ref, o_ref,
                       m_sc, l_sc, acc_sc):
    """One (batch, L-tile, S-tile) step processing all H heads.

    q_ref : (1, tL, H, E)      k_ref : (1, tS, H, E)     v_ref : (1, tS, H, D)
    am_ref: (tL, tS)   additive attention-mask tile (shared over batch/head)
    kl_ref: (1, 1, tS) additive key-length mask tile for this batch element
    o_ref : (1, tL, H*D) lane-dense output slab
    m_sc/l_sc: (H, tL, 1) f32 running max / denominator
    acc_sc   : (H, tL, D) f32 running numerator
    """
    si = pl.program_id(2)
    num_heads = q_ref.shape[2]
    head_dim_e = q_ref.shape[3]

    @pl.when(si == 0)
    def _init():
        m_sc[...] = jnp.full(m_sc.shape, -jnp.inf, dtype=m_sc.dtype)
        l_sc[...] = jnp.zeros(l_sc.shape, dtype=l_sc.dtype)
        acc_sc[...] = jnp.zeros(acc_sc.shape, dtype=acc_sc.dtype)

    # Additive bias for this (tL, tS) tile: attn-mask tile + key-length row
    # (broadcast over query rows).  Hoisted out of the head loop.
    bias = am_ref[...] + kl_ref[0]                 # (tL,tS) + (1,tS) -> (tL,tS)

    scale = 1.0 / math.sqrt(head_dim_e)

    # Static (unrolled) loop over heads: each head is a clean 2-D MXU matmul.
    for h in range(num_heads):
        q_h = q_ref[0, :, h, :] * scale            # (tL, E), native dtype
        k_h = k_ref[0, :, h, :]                    # (tS, E), native dtype
        v_h = v_ref[0, :, h, :]                    # (tS, D), native dtype

        # Q @ K^T as a direct contraction on E (no explicit transpose of K).
        s = lax.dot_general(q_h, k_h,
                            dimension_numbers=(((1,), (1,)), ((), ())),
                            preferred_element_type=jnp.float32)   # (tL,tS) f32
        s = s + bias

        m_prev = m_sc[h]                                          # (tL, 1)
        m_new = jnp.maximum(m_prev, jnp.max(s, axis=-1, keepdims=True))
        alpha = jnp.exp(m_prev - m_new)                           # (tL, 1)
        p = jnp.exp(s - m_new)                                    # (tL, tS) f32

        l_sc[h] = alpha * l_sc[h] + jnp.sum(p, axis=-1, keepdims=True)
        acc_sc[h] = alpha * acc_sc[h] + lax.dot_general(
            p.astype(v_h.dtype), v_h,
            dimension_numbers=(((1,), (0,)), ((), ())),
            preferred_element_type=jnp.float32)                   # (tL, D) f32
        m_sc[h] = m_new

    @pl.when(si == pl.num_programs(2) - 1)
    def _finalize():
        outs = []
        for h in range(num_heads):
            l_h = l_sc[h]                                         # (tL, 1)
            r = pl.reciprocal(l_h, approx=True)                   # EUP slot
            r = r * (2.0 - l_h * r)                               # 1 NR step -> ~f32 exact
            outs.append(acc_sc[h] * r)                            # (tL, D)
        # Single lane-dense (tL, H*D) store instead of H narrow masked stores.
        o_ref[0] = jnp.concatenate(outs, axis=-1).astype(o_ref.dtype)


def _pick_tile(n, cap, align):
    """Largest t <= cap with n % t == 0 and t % align == 0; else n (no tiling)."""
    if n <= cap:
        return n
    for t in range(cap, 0, -1):
        if n % t == 0 and t % align == 0:
            return t
    return n


def full_generalised_attention(queries, keys, values, attn_mask_add, key_len_add,
                               *, tl_cap=256, ts_cap=512):
    """queries (N,L,H,E), keys (N,S,H,E), values (N,S,H,D),
    attn_mask_add (L,S) additive float mask, key_len_add (N,S) additive float
    mask.  Returns (N,L,H,D)."""
    N, L, H, E = queries.shape
    _, S, _, D = values.shape

    # Tile budgets sized so the double-buffered working set stays well inside
    # the 64 MiB v7x VMEM (and comfortably inside v5e/v6e 128 MiB); re-derive
    # the caps if H*E / H*D are unusually large.
    tL = _pick_tile(L, tl_cap, 8)     # sublane dim of the mask tile
    tS = _pick_tile(S, ts_cap, 128)   # lane dim of the mask / key-length tiles

    am = attn_mask_add.astype(jnp.float32)
    kl = key_len_add.astype(jnp.float32).reshape(N, 1, S)

    grid = (N, L // tL, S // tS)

    out = pl.pallas_call(
        _flash_attn_kernel,
        out_shape=jax.ShapeDtypeStruct((N, L, H * D), queries.dtype),
        grid_spec=pltpu.PrefetchScalarGridSpec(
            num_scalar_prefetch=0,
            grid=grid,
            in_specs=[
                pl.BlockSpec((1, tL, H, E), lambda n, li, si: (n, li, 0, 0)),
                pl.BlockSpec((1, tS, H, E), lambda n, li, si: (n, si, 0, 0)),
                pl.BlockSpec((1, tS, H, D), lambda n, li, si: (n, si, 0, 0)),
                pl.BlockSpec((tL, tS), lambda n, li, si: (li, si)),
                pl.BlockSpec((1, 1, tS), lambda n, li, si: (n, 0, si)),
            ],
            out_specs=pl.BlockSpec((1, tL, H * D), lambda n, li, si: (n, li, 0)),
            scratch_shapes=[
                pltpu.VMEM((H, tL, 1), jnp.float32),   # running max
                pltpu.VMEM((H, tL, 1), jnp.float32),   # running denominator
                pltpu.VMEM((H, tL, D), jnp.float32),   # running numerator
            ],
        ),
        compiler_params=pltpu.CompilerParams(
            dimension_semantics=("parallel", "parallel", "arbitrary"),
            vmem_limit_bytes=48 * 1024 * 1024,
        ),
    )(queries, keys, values, am, kl)

    return out.reshape(N, L, H, D)     # metadata-only reshape back to (N,L,H,D)


def _reference(queries, keys, values, attn_mask_add, key_len_add):
    E = queries.shape[-1]
    qk = jnp.einsum("nlhe,nshe->nhls",
                    queries.astype(jnp.float32), keys.astype(jnp.float32))
    qk = qk / math.sqrt(E)
    qk = qk + attn_mask_add[None, None] + key_len_add[:, None, None, :]
    a = jax.nn.softmax(qk, axis=-1)
    return jnp.einsum("nhls,nshd->nlhd", a,
                      values.astype(jnp.float32)).astype(values.dtype)


if __name__ == "__main__":
    N, L, S, H, E, D = 2, 8, 8, 4, 32, 32

    key = jax.random.PRNGKey(0)
    kq, kk, kv = jax.random.split(key, 3)
    queries = jax.random.normal(kq, (N, L, H, E), dtype=jnp.float32)
    keys_ = jax.random.normal(kk, (N, S, H, E), dtype=jnp.float32)
    values = jax.random.normal(kv, (N, S, H, D), dtype=jnp.float32)

    # attn_mask: full (all positions allowed) -> additive zeros.
    attn_mask_add = jnp.zeros((L, S), dtype=jnp.float32)
    # key_lengths: per-batch valid key lengths -> additive -1e30 on padding.
    key_lengths = jnp.array([S, S - 2], dtype=jnp.int32)
    key_len_add = jnp.where(
        jnp.arange(S)[None, :] < key_lengths[:, None], 0.0, -1e30
    ).astype(jnp.float32)

    out = full_generalised_attention(queries, keys_, values,
                                     attn_mask_add, key_len_add)
    out = jax.block_until_ready(out)

    ref = _reference(queries, keys_, values, attn_mask_add, key_len_add)
    assert out.shape == (N, L, H, D)
    assert jnp.allclose(out, ref, atol=1e-3, rtol=1e-3), "mismatch vs reference"

    print("KERNEL_OK")
</pallas_src>

<mosaic_0001>
module attributes {stable_mosaic.version = 11 : i64} {
  func.func @_flash_attn_kernel(%arg0: i32, %arg1: i32, %arg2: i32, %arg3: memref<1x8x4x32xf32, #tpu.memory_space<vmem>>, %arg4: memref<1x8x4x32xf32, #tpu.memory_space<vmem>>, %arg5: memref<1x8x4x32xf32, #tpu.memory_space<vmem>>, %arg6: memref<8x8xf32, #tpu.memory_space<vmem>>, %arg7: memref<1x1x8xf32, #tpu.memory_space<vmem>>, %arg8: memref<1x8x128xf32, #tpu.memory_space<vmem>>, %arg9: memref<4x8x1xf32, #tpu.memory_space<vmem>>, %arg10: memref<4x8x1xf32, #tpu.memory_space<vmem>>, %arg11: memref<4x8x32xf32, #tpu.memory_space<vmem>>) attributes {dimension_semantics = [#tpu.dimension_semantics<parallel>, #tpu.dimension_semantics<parallel>, #tpu.dimension_semantics<arbitrary>], iteration_bounds = array<i64: 2, 1, 1>, scalar_prefetch = 0 : i64, scratch_operands = 3 : i64, tpu.core_type = #tpu.core_type<tc>, window_params = [{transform_indices = @transform_0, window_bounds = array<i64: 1, 8, 4, 32>}, {transform_indices = @transform_1, window_bounds = array<i64: 1, 8, 4, 32>}, {transform_indices = @transform_2, window_bounds = array<i64: 1, 8, 4, 32>}, {transform_indices = @transform_3, window_bounds = array<i64: 8, 8>}, {transform_indices = @transform_4, window_bounds = array<i64: 1, 1, 8>}, {transform_indices = @transform_5, window_bounds = array<i64: 1, 8, 128>}]} {
    %c0_i32 = arith.constant 0 : i32
    %0 = arith.cmpi eq, %arg2, %c0_i32 : i32
    %1 = arith.extui %0 : i1 to i32
    %c0_i32_0 = arith.constant 0 : i32
    %2 = arith.cmpi ne, %1, %c0_i32_0 : i32
    scf.if %2 {
      %cst_143 = arith.constant 0xFF800000 : f32
      %175 = vector.broadcast %cst_143 : f32 to vector<4x8x1xf32>
      %c0_144 = arith.constant 0 : index
      %c0_145 = arith.constant 0 : index
      %c0_146 = arith.constant 0 : index
      %176 = vector.load %arg9[%c0_144, %c0_145, %c0_146] : memref<4x8x1xf32, #tpu.memory_space<vmem>>, vector<4x8x1xf32>
      tpu.vector_store %arg9[%c0_144, %c0_145, %c0_146], %175 {strides = array<i32>} : memref<4x8x1xf32, #tpu.memory_space<vmem>>, vector<4x8x1xf32>,
      %cst_147 = arith.constant 0.000000e+00 : f32
      %177 = vector.broadcast %cst_147 : f32 to vector<4x8x1xf32>
      %c0_148 = arith.constant 0 : index
      %c0_149 = arith.constant 0 : index
      %c0_150 = arith.constant 0 : index
      %178 = vector.load %arg10[%c0_148, %c0_149, %c0_150] : memref<4x8x1xf32, #tpu.memory_space<vmem>>, vector<4x8x1xf32>
      tpu.vector_store %arg10[%c0_148, %c0_149, %c0_150], %177 {strides = array<i32>} : memref<4x8x1xf32, #tpu.memory_space<vmem>>, vector<4x8x1xf32>,
      %cst_151 = arith.constant 0.000000e+00 : f32
      %179 = vector.broadcast %cst_151 : f32 to vector<4x8x32xf32>
      %c0_152 = arith.constant 0 : index
      %c0_153 = arith.constant 0 : index
      %c0_154 = arith.constant 0 : index
      %180 = vector.load %arg11[%c0_152, %c0_153, %c0_154] : memref<4x8x32xf32, #tpu.memory_space<vmem>>, vector<4x8x32xf32>
      tpu.vector_store %arg11[%c0_152, %c0_153, %c0_154], %179 {strides = array<i32>} : memref<4x8x32xf32, #tpu.memory_space<vmem>>, vector<4x8x32xf32>,
    } else {
    }
    %c0 = arith.constant 0 : index
    %c0_1 = arith.constant 0 : index
    %3 = vector.load %arg6[%c0, %c0_1] : memref<8x8xf32, #tpu.memory_space<vmem>>, vector<8x8xf32>
    %c0_2 = arith.constant 0 : index
    %c0_3 = arith.constant 0 : index
    %c0_4 = arith.constant 0 : index
    %4 = vector.load %arg7[%c0_2, %c0_3, %c0_4] : memref<1x1x8xf32, #tpu.memory_space<vmem>>, vector<1x1x8xf32>
    %5 = vector.shape_cast %4 : vector<1x1x8xf32> to vector<1x8xf32>
    %6 = vector.broadcast %5 : vector<1x8xf32> to vector<8x8xf32>
    %7 = arith.addf %3, %6 : vector<8x8xf32>
    %c0_5 = arith.constant 0 : index
    %c0_6 = arith.constant 0 : index
    %c0_7 = arith.constant 0 : index
    %c0_8 = arith.constant 0 : index
    %8 = vector.load %arg3[%c0_5, %c0_6, %c0_7, %c0_8] : memref<1x8x4x32xf32, #tpu.memory_space<vmem>>, vector<1x8x1x32xf32>
    %9 = vector.shape_cast %8 : vector<1x8x1x32xf32> to vector<8x32xf32>
    %cst = arith.constant 0.176776692 : f32
    %10 = vector.broadcast %cst : f32 to vector<8x32xf32>
    %11 = arith.mulf %9, %10 : vector<8x32xf32>
    %c0_9 = arith.constant 0 : index
    %c0_10 = arith.constant 0 : index
    %c0_11 = arith.constant 0 : index
    %c0_12 = arith.constant 0 : index
    %12 = vector.load %arg4[%c0_9, %c0_10, %c0_11, %c0_12] : memref<1x8x4x32xf32, #tpu.memory_space<vmem>>, vector<1x8x1x32xf32>
    %13 = vector.shape_cast %12 : vector<1x8x1x32xf32> to vector<8x32xf32>
    %c0_13 = arith.constant 0 : index
    %c0_14 = arith.constant 0 : index
    %c0_15 = arith.constant 0 : index
    %c0_16 = arith.constant 0 : index
    %14 = vector.load %arg5[%c0_13, %c0_14, %c0_15, %c0_16] : memref<1x8x4x32xf32, #tpu.memory_space<vmem>>, vector<1x8x1x32xf32>
    %15 = vector.shape_cast %14 : vector<1x8x1x32xf32> to vector<8x32xf32>
    %cst_17 = arith.constant dense<0.000000e+00> : vector<8x8xf32>
    %16 = tpu.matmul %11, %13, %cst_17 {dimension_numbers = #tpu.dot_dimension_numbers<[1], [1], [0], [0], [0, 0, 1, 0], [], []>} : vector<8x32xf32>, vector<8x32xf32>, vector<8x8xf32> -> vector<8x8xf32>
    %17 = arith.addf %16, %7 : vector<8x8xf32>
    %c0_18 = arith.constant 0 : index
    %c0_19 = arith.constant 0 : index
    %c0_20 = arith.constant 0 : index
    %18 = vector.load %arg9[%c0_18, %c0_19, %c0_20] : memref<4x8x1xf32, #tpu.memory_space<vmem>>, vector<1x8x1xf32>
    %19 = vector.shape_cast %18 : vector<1x8x1xf32> to vector<8x1xf32>
    %cst_21 = arith.constant dense<0xFF800000> : vector<8xf32>
    %20 = vector.multi_reduction <maximumf>, %17, %cst_21 [1] : vector<8x8xf32> to vector<8xf32>
    %21 = vector.shape_cast %20 : vector<8xf32> to vector<8x1xf32>
    %22 = arith.maximumf %19, %21 : vector<8x1xf32>
    %23 = arith.subf %19, %22 : vector<8x1xf32>
    %24 = math.exp %23 : vector<8x1xf32>
    %25 = vector.broadcast %22 : vector<8x1xf32> to vector<8x8xf32>
    %26 = arith.subf %17, %25 : vector<8x8xf32>
    %27 = math.exp %26 : vector<8x8xf32>
    %c0_22 = arith.constant 0 : index
    %c0_23 = arith.constant 0 : index
    %c0_24 = arith.constant 0 : index
    %28 = vector.load %arg10[%c0_22, %c0_23, %c0_24] : memref<4x8x1xf32, #tpu.memory_space<vmem>>, vector<1x8x1xf32>
    %29 = vector.shape_cast %28 : vector<1x8x1xf32> to vector<8x1xf32>
    %30 = arith.mulf %24, %29 : vector<8x1xf32>
    %cst_25 = arith.constant dense<0.000000e+00> : vector<8xf32>
    %31 = vector.multi_reduction <add>, %27, %cst_25 [1] : vector<8x8xf32> to vector<8xf32>
    %32 = vector.shape_cast %31 : vector<8xf32> to vector<8x1xf32>
    %33 = arith.addf %30, %32 : vector<8x1xf32>
    %c0_26 = arith.constant 0 : index
    %c0_27 = arith.constant 0 : index
    %c0_28 = arith.constant 0 : index
    %34 = vector.load %arg10[%c0_26, %c0_27, %c0_28] : memref<4x8x1xf32, #tpu.memory_space<vmem>>, vector<1x8x1xf32>
    %35 = vector.shape_cast %34 : vector<1x8x1xf32> to vector<8x1xf32>
    %36 = vector.shape_cast %33 : vector<8x1xf32> to vector<1x8x1xf32>
    tpu.vector_store %arg10[%c0_26, %c0_27, %c0_28], %36 {strides = array<i32>} : memref<4x8x1xf32, #tpu.memory_space<vmem>>, vector<1x8x1xf32>,
    %c0_29 = arith.constant 0 : index
    %c0_30 = arith.constant 0 : index
    %c0_31 = arith.constant 0 : index
    %37 = vector.load %arg11[%c0_29, %c0_30, %c0_31] : memref<4x8x32xf32, #tpu.memory_space<vmem>>, vector<1x8x32xf32>
    %38 = vector.shape_cast %37 : vector<1x8x32xf32> to vector<8x32xf32>
    %39 = vector.broadcast %24 : vector<8x1xf32> to vector<8x32xf32>
    %40 = arith.mulf %39, %38 : vector<8x32xf32>
    %cst_32 = arith.constant dense<0.000000e+00> : vector<8x32xf32>
    %41 = tpu.matmul %27, %15, %cst_32 {dimension_numbers = #tpu.dot_dimension_numbers<[1], [0], [0], [1], [0, 0, 1, 1], [], []>} : vector<8x8xf32>, vector<8x32xf32>, vector<8x32xf32> -> vector<8x32xf32>
    %42 = arith.addf %40, %41 : vector<8x32xf32>
    %c0_33 = arith.constant 0 : index
    %c0_34 = arith.constant 0 : index
    %c0_35 = arith.constant 0 : index
    %43 = vector.load %arg11[%c0_33, %c0_34, %c0_35] : memref<4x8x32xf32, #tpu.memory_space<vmem>>, vector<1x8x32xf32>
    %44 = vector.shape_cast %43 : vector<1x8x32xf32> to vector<8x32xf32>
    %45 = vector.shape_cast %42 : vector<8x32xf32> to vector<1x8x32xf32>
    tpu.vector_store %arg11[%c0_33, %c0_34, %c0_35], %45 {strides = array<i32>} : memref<4x8x32xf32, #tpu.memory_space<vmem>>, vector<1x8x32xf32>,
    %c0_36 = arith.constant 0 : index
    %c0_37 = arith.constant 0 : index
    %c0_38 = arith.constant 0 : index
    %46 = vector.load %arg9[%c0_36, %c0_37, %c0_38] : memref<4x8x1xf32, #tpu.memory_space<vmem>>, vector<1x8x1xf32>
    %47 = vector.shape_cast %46 : vector<1x8x1xf32> to vector<8x1xf32>
    %48 = vector.shape_cast %22 : vector<8x1xf32> to vector<1x8x1xf32>
    tpu.vector_store %arg9[%c0_36, %c0_37, %c0_38], %48 {strides = array<i32>} : memref<4x8x1xf32, #tpu.memory_space<vmem>>, vector<1x8x1xf32>,
    %c0_39 = arith.constant 0 : index
    %c0_40 = arith.constant 0 : index
    %c1 = arith.constant 1 : index
    %c0_41 = arith.constant 0 : index
    %49 = vector.load %arg3[%c0_39, %c0_40, %c1, %c0_41] : memref<1x8x4x32xf32, #tpu.memory_space<vmem>>, vector<1x8x1x32xf32>
    %50 = vector.shape_cast %49 : vector<1x8x1x32xf32> to vector<8x32xf32>
    %cst_42 = arith.constant 0.176776692 : f32
    %51 = vector.broadcast %cst_42 : f32 to vector<8x32xf32>
    %52 = arith.mulf %50, %51 : vector<8x32xf32>
    %c0_43 = arith.constant 0 : index
    %c0_44 = arith.constant 0 : index
    %c1_45 = arith.constant 1 : index
    %c0_46 = arith.constant 0 : index
    %53 = vector.load %arg4[%c0_43, %c0_44, %c1_45, %c0_46] : memref<1x8x4x32xf32, #tpu.memory_space<vmem>>, vector<1x8x1x32xf32>
    %54 = vector.shape_cast %53 : vector<1x8x1x32xf32> to vector<8x32xf32>
    %c0_47 = arith.constant 0 : index
    %c0_48 = arith.constant 0 : index
    %c1_49 = arith.constant 1 : index
    %c0_50 = arith.constant 0 : index
    %55 = vector.load %arg5[%c0_47, %c0_48, %c1_49, %c0_50] : memref<1x8x4x32xf32, #tpu.memory_space<vmem>>, vector<1x8x1x32xf32>
    %56 = vector.shape_cast %55 : vector<1x8x1x32xf32> to vector<8x32xf32>
    %cst_51 = arith.constant dense<0.000000e+00> : vector<8x8xf32>
    %57 = tpu.matmul %52, %54, %cst_51 {dimension_numbers = #tpu.dot_dimension_numbers<[1], [1], [0], [0], [0, 0, 1, 0], [], []>} : vector<8x32xf32>, vector<8x32xf32>, vector<8x8xf32> -> vector<8x8xf32>
    %58 = arith.addf %57, %7 : vector<8x8xf32>
    %c1_52 = arith.constant 1 : index
    %c0_53 = arith.constant 0 : index
    %c0_54 = arith.constant 0 : index
    %59 = vector.load %arg9[%c1_52, %c0_53, %c0_54] : memref<4x8x1xf32, #tpu.memory_space<vmem>>, vector<1x8x1xf32>
    %60 = vector.shape_cast %59 : vector<1x8x1xf32> to vector<8x1xf32>
    %cst_55 = arith.constant dense<0xFF800000> : vector<8xf32>
    %61 = vector.multi_reduction <maximumf>, %58, %cst_55 [1] : vector<8x8xf32> to vector<8xf32>
    %62 = vector.shape_cast %61 : vector<8xf32> to vector<8x1xf32>
    %63 = arith.maximumf %60, %62 : vector<8x1xf32>
    %64 = arith.subf %60, %63 : vector<8x1xf32>
    %65 = math.exp %64 : vector<8x1xf32>
    %66 = vector.broadcast %63 : vector<8x1xf32> to vector<8x8xf32>
    %67 = arith.subf %58, %66 : vector<8x8xf32>
    %68 = math.exp %67 : vector<8x8xf32>
    %c1_56 = arith.constant 1 : index
    %c0_57 = arith.constant 0 : index
    %c0_58 = arith.constant 0 : index
    %69 = vector.load %arg10[%c1_56, %c0_57, %c0_58] : memref<4x8x1xf32, #tpu.memory_space<vmem>>, vector<1x8x1xf32>
    %70 = vector.shape_cast %69 : vector<1x8x1xf32> to vector<8x1xf32>
    %71 = arith.mulf %65, %70 : vector<8x1xf32>
    %cst_59 = arith.constant dense<0.000000e+00> : vector<8xf32>
    %72 = vector.multi_reduction <add>, %68, %cst_59 [1] : vector<8x8xf32> to vector<8xf32>
    %73 = vector.shape_cast %72 : vector<8xf32> to vector<8x1xf32>
    %74 = arith.addf %71, %73 : vector<8x1xf32>
    %c1_60 = arith.constant 1 : index
    %c0_61 = arith.constant 0 : index
    %c0_62 = arith.constant 0 : index
    %75 = vector.load %arg10[%c1_60, %c0_61, %c0_62] : memref<4x8x1xf32, #tpu.memory_space<vmem>>, vector<1x8x1xf32>
    %76 = vector.shape_cast %75 : vector<1x8x1xf32> to vector<8x1xf32>
    %77 = vector.shape_cast %74 : vector<8x1xf32> to vector<1x8x1xf32>
    tpu.vector_store %arg10[%c1_60, %c0_61, %c0_62], %77 {strides = array<i32>} : memref<4x8x1xf32, #tpu.memory_space<vmem>>, vector<1x8x1xf32>,
    %c1_63 = arith.constant 1 : index
    %c0_64 = arith.constant 0 : index
    %c0_65 = arith.constant 0 : index
    %78 = vector.load %arg11[%c1_63, %c0_64, %c0_65] : memref<4x8x32xf32, #tpu.memory_space<vmem>>, vector<1x8x32xf32>
    %79 = vector.shape_cast %78 : vector<1x8x32xf32> to vector<8x32xf32>
    %80 = vector.broadcast %65 : vector<8x1xf32> to vector<8x32xf32>
    %81 = arith.mulf %80, %79 : vector<8x32xf32>
    %cst_66 = arith.constant dense<0.000000e+00> : vector<8x32xf32>
    %82 = tpu.matmul %68, %56, %cst_66 {dimension_numbers = #tpu.dot_dimension_numbers<[1], [0], [0], [1], [0, 0, 1, 1], [], []>} : vector<8x8xf32>, vector<8x32xf32>, vector<8x32xf32> -> vector<8x32xf32>
    %83 = arith.addf %81, %82 : vector<8x32xf32>
    %c1_67 = arith.constant 1 : index
    %c0_68 = arith.constant 0 : index
    %c0_69 = arith.constant 0 : index
    %84 = vector.load %arg11[%c1_67, %c0_68, %c0_69] : memref<4x8x32xf32, #tpu.memory_space<vmem>>, vector<1x8x32xf32>
    %85 = vector.shape_cast %84 : vector<1x8x32xf32> to vector<8x32xf32>
    %86 = vector.shape_cast %83 : vector<8x32xf32> to vector<1x8x32xf32>
    tpu.vector_store %arg11[%c1_67, %c0_68, %c0_69], %86 {strides = array<i32>} : memref<4x8x32xf32, #tpu.memory_space<vmem>>, vector<1x8x32xf32>,
    %c1_70 = arith.constant 1 : index
    %c0_71 = arith.constant 0 : index
    %c0_72 = arith.constant 0 : index
    %87 = vector.load %arg9[%c1_70, %c0_71, %c0_72] : memref<4x8x1xf32, #tpu.memory_space<vmem>>, vector<1x8x1xf32>
    %88 = vector.shape_cast %87 : vector<1x8x1xf32> to vector<8x1xf32>
    %89 = vector.shape_cast %63 : vector<8x1xf32> to vector<1x8x1xf32>
    tpu.vector_store %arg9[%c1_70, %c0_71, %c0_72], %89 {strides = array<i32>} : memref<4x8x1xf32, #tpu.memory_space<vmem>>, vector<1x8x1xf32>,
    %c0_73 = arith.constant 0 : index
    %c0_74 = arith.constant 0 : index
    %c2 = arith.constant 2 : index
    %c0_75 = arith.constant 0 : index
    %90 = vector.load %arg3[%c0_73, %c0_74, %c2, %c0_75] : memref<1x8x4x32xf32, #tpu.memory_space<vmem>>, vector<1x8x1x32xf32>
    %91 = vector.shape_cast %90 : vector<1x8x1x32xf32> to vector<8x32xf32>
    %cst_76 = arith.constant 0.176776692 : f32
    %92 = vector.broadcast %cst_76 : f32 to vector<8x32xf32>
    %93 = arith.mulf %91, %92 : vector<8x32xf32>
    %c0_77 = arith.constant 0 : index
    %c0_78 = arith.constant 0 : index
    %c2_79 = arith.constant 2 : index
    %c0_80 = arith.constant 0 : index
    %94 = vector.load %arg4[%c0_77, %c0_78, %c2_79, %c0_80] : memref<1x8x4x32xf32, #tpu.memory_space<vmem>>, vector<1x8x1x32xf32>
    %95 = vector.shape_cast %94 : vector<1x8x1x32xf32> to vector<8x32xf32>
    %c0_81 = arith.constant 0 : index
    %c0_82 = arith.constant 0 : index
    %c2_83 = arith.constant 2 : index
    %c0_84 = arith.constant 0 : index
    %96 = vector.load %arg5[%c0_81, %c0_82, %c2_83, %c0_84] : memref<1x8x4x32xf32, #tpu.memory_space<vmem>>, vector<1x8x1x32xf32>
    %97 = vector.shape_cast %96 : vector<1x8x1x32xf32> to vector<8x32xf32>
    %cst_85 = arith.constant dense<0.000000e+00> : vector<8x8xf32>
    %98 = tpu.matmul %93, %95, %cst_85 {dimension_numbers = #tpu.dot_dimension_numbers<[1], [1], [0], [0], [0, 0, 1, 0], [], []>} : vector<8x32xf32>, vector<8x32xf32>, vector<8x8xf32> -> vector<8x8xf32>
    %99 = arith.addf %98, %7 : vector<8x8xf32>
    %c2_86 = arith.constant 2 : index
    %c0_87 = arith.constant 0 : index
    %c0_88 = arith.constant 0 : index
    %100 = vector.load %arg9[%c2_86, %c0_87, %c0_88] : memref<4x8x1xf32, #tpu.memory_space<vmem>>, vector<1x8x1xf32>
    %101 = vector.shape_cast %100 : vector<1x8x1xf32> to vector<8x1xf32>
    %cst_89 = arith.constant dense<0xFF800000> : vector<8xf32>
    %102 = vector.multi_reduction <maximumf>, %99, %cst_89 [1] : vector<8x8xf32> to vector<8xf32>
    %103 = vector.shape_cast %102 : vector<8xf32> to vector<8x1xf32>
    %104 = arith.maximumf %101, %103 : vector<8x1xf32>
    %105 = arith.subf %101, %104 : vector<8x1xf32>
    %106 = math.exp %105 : vector<8x1xf32>
    %107 = vector.broadcast %104 : vector<8x1xf32> to vector<8x8xf32>
    %108 = arith.subf %99, %107 : vector<8x8xf32>
    %109 = math.exp %108 : vector<8x8xf32>
    %c2_90 = arith.constant 2 : index
    %c0_91 = arith.constant 0 : index
    %c0_92 = arith.constant 0 : index
    %110 = vector.load %arg10[%c2_90, %c0_91, %c0_92] : memref<4x8x1xf32, #tpu.memory_space<vmem>>, vector<1x8x1xf32>
    %111 = vector.shape_cast %110 : vector<1x8x1xf32> to vector<8x1xf32>
    %112 = arith.mulf %106, %111 : vector<8x1xf32>
    %cst_93 = arith.constant dense<0.000000e+00> : vector<8xf32>
    %113 = vector.multi_reduction <add>, %109, %cst_93 [1] : vector<8x8xf32> to vector<8xf32>
    %114 = vector.shape_cast %113 : vector<8xf32> to vector<8x1xf32>
    %115 = arith.addf %112, %114 : vector<8x1xf32>
    %c2_94 = arith.constant 2 : index
    %c0_95 = arith.constant 0 : index
    %c0_96 = arith.constant 0 : index
    %116 = vector.load %arg10[%c2_94, %c0_95, %c0_96] : memref<4x8x1xf32, #tpu.memory_space<vmem>>, vector<1x8x1xf32>
    %117 = vector.shape_cast %116 : vector<1x8x1xf32> to vector<8x1xf32>
    %118 = vector.shape_cast %115 : vector<8x1xf32> to vector<1x8x1xf32>
    tpu.vector_store %arg10[%c2_94, %c0_95, %c0_96], %118 {strides = array<i32>} : memref<4x8x1xf32, #tpu.memory_space<vmem>>, vector<1x8x1xf32>,
    %c2_97 = arith.constant 2 : index
    %c0_98 = arith.constant 0 : index
    %c0_99 = arith.constant 0 : index
    %119 = vector.load %arg11[%c2_97, %c0_98, %c0_99] : memref<4x8x32xf32, #tpu.memory_space<vmem>>, vector<1x8x32xf32>
    %120 = vector.shape_cast %119 : vector<1x8x32xf32> to vector<8x32xf32>
    %121 = vector.broadcast %106 : vector<8x1xf32> to vector<8x32xf32>
    %122 = arith.mulf %121, %120 : vector<8x32xf32>
    %cst_100 = arith.constant dense<0.000000e+00> : vector<8x32xf32>
    %123 = tpu.matmul %109, %97, %cst_100 {dimension_numbers = #tpu.dot_dimension_numbers<[1], [0], [0], [1], [0, 0, 1, 1], [], []>} : vector<8x8xf32>, vector<8x32xf32>, vector<8x32xf32> -> vector<8x32xf32>
    %124 = arith.addf %122, %123 : vector<8x32xf32>
    %c2_101 = arith.constant 2 : index
    %c0_102 = arith.constant 0 : index
    %c0_103 = arith.constant 0 : index
    %125 = vector.load %arg11[%c2_101, %c0_102, %c0_103] : memref<4x8x32xf32, #tpu.memory_space<vmem>>, vector<1x8x32xf32>
    %126 = vector.shape_cast %125 : vector<1x8x32xf32> to vector<8x32xf32>
    %127 = vector.shape_cast %124 : vector<8x32xf32> to vector<1x8x32xf32>
    tpu.vector_store %arg11[%c2_101, %c0_102, %c0_103], %127 {strides = array<i32>} : memref<4x8x32xf32, #tpu.memory_space<vmem>>, vector<1x8x32xf32>,
    %c2_104 = arith.constant 2 : index
    %c0_105 = arith.constant 0 : index
    %c0_106 = arith.constant 0 : index
    %128 = vector.load %arg9[%c2_104, %c0_105, %c0_106] : memref<4x8x1xf32, #tpu.memory_space<vmem>>, vector<1x8x1xf32>
    %129 = vector.shape_cast %128 : vector<1x8x1xf32> to vector<8x1xf32>
    %130 = vector.shape_cast %104 : vector<8x1xf32> to vector<1x8x1xf32>
    tpu.vector_store %arg9[%c2_104, %c0_105, %c0_106], %130 {strides = array<i32>} : memref<4x8x1xf32, #tpu.memory_space<vmem>>, vector<1x8x1xf32>,
    %c0_107 = arith.constant 0 : index
    %c0_108 = arith.constant 0 : index
    %c3 = arith.constant 3 : index
    %c0_109 = arith.constant 0 : index
    %131 = vector.load %arg3[%c0_107, %c0_108, %c3, %c0_109] : memref<1x8x4x32xf32, #tpu.memory_space<vmem>>, vector<1x8x1x32xf32>
    %132 = vector.shape_cast %131 : vector<1x8x1x32xf32> to vector<8x32xf32>
    %cst_110 = arith.constant 0.176776692 : f32
    %133 = vector.broadcast %cst_110 : f32 to vector<8x32xf32>
    %134 = arith.mulf %132, %133 : vector<8x32xf32>
    %c0_111 = arith.constant 0 : index
    %c0_112 = arith.constant 0 : index
    %c3_113 = arith.constant 3 : index
    %c0_114 = arith.constant 0 : index
    %135 = vector.load %arg4[%c0_111, %c0_112, %c3_113, %c0_114] : memref<1x8x4x32xf32, #tpu.memory_space<vmem>>, vector<1x8x1x32xf32>
    %136 = vector.shape_cast %135 : vector<1x8x1x32xf32> to vector<8x32xf32>
    %c0_115 = arith.constant 0 : index
    %c0_116 = arith.constant 0 : index
    %c3_117 = arith.constant 3 : index
    %c0_118 = arith.constant 0 : index
    %137 = vector.load %arg5[%c0_115, %c0_116, %c3_117, %c0_118] : memref<1x8x4x32xf32, #tpu.memory_space<vmem>>, vector<1x8x1x32xf32>
    %138 = vector.shape_cast %137 : vector<1x8x1x32xf32> to vector<8x32xf32>
    %cst_119 = arith.constant dense<0.000000e+00> : vector<8x8xf32>
    %139 = tpu.matmul %134, %136, %cst_119 {dimension_numbers = #tpu.dot_dimension_numbers<[1], [1], [0], [0], [0, 0, 1, 0], [], []>} : vector<8x32xf32>, vector<8x32xf32>, vector<8x8xf32> -> vector<8x8xf32>
    %140 = arith.addf %139, %7 : vector<8x8xf32>
    %c3_120 = arith.constant 3 : index
    %c0_121 = arith.constant 0 : index
    %c0_122 = arith.constant 0 : index
    %141 = vector.load %arg9[%c3_120, %c0_121, %c0_122] : memref<4x8x1xf32, #tpu.memory_space<vmem>>, vector<1x8x1xf32>
    %142 = vector.shape_cast %141 : vector<1x8x1xf32> to vector<8x1xf32>
    %cst_123 = arith.constant dense<0xFF800000> : vector<8xf32>
    %143 = vector.multi_reduction <maximumf>, %140, %cst_123 [1] : vector<8x8xf32> to vector<8xf32>
    %144 = vector.shape_cast %143 : vector<8xf32> to vector<8x1xf32>
    %145 = arith.maximumf %142, %144 : vector<8x1xf32>
    %146 = arith.subf %142, %145 : vector<8x1xf32>
    %147 = math.exp %146 : vector<8x1xf32>
    %148 = vector.broadcast %145 : vector<8x1xf32> to vector<8x8xf32>
    %149 = arith.subf %140, %148 : vector<8x8xf32>
    %150 = math.exp %149 : vector<8x8xf32>
    %c3_124 = arith.constant 3 : index
    %c0_125 = arith.constant 0 : index
    %c0_126 = arith.constant 0 : index
    %151 = vector.load %arg10[%c3_124, %c0_125, %c0_126] : memref<4x8x1xf32, #tpu.memory_space<vmem>>, vector<1x8x1xf32>
    %152 = vector.shape_cast %151 : vector<1x8x1xf32> to vector<8x1xf32>
    %153 = arith.mulf %147, %152 : vector<8x1xf32>
    %cst_127 = arith.constant dense<0.000000e+00> : vector<8xf32>
    %154 = vector.multi_reduction <add>, %150, %cst_127 [1] : vector<8x8xf32> to vector<8xf32>
    %155 = vector.shape_cast %154 : vector<8xf32> to vector<8x1xf32>
    %156 = arith.addf %153, %155 : vector<8x1xf32>
    %c3_128 = arith.constant 3 : index
    %c0_129 = arith.constant 0 : index
    %c0_130 = arith.constant 0 : index
    %157 = vector.load %arg10[%c3_128, %c0_129, %c0_130] : memref<4x8x1xf32, #tpu.memory_space<vmem>>, vector<1x8x1xf32>
    %158 = vector.shape_cast %157 : vector<1x8x1xf32> to vector<8x1xf32>
    %159 = vector.shape_cast %156 : vector<8x1xf32> to vector<1x8x1xf32>
    tpu.vector_store %arg10[%c3_128, %c0_129, %c0_130], %159 {strides = array<i32>} : memref<4x8x1xf32, #tpu.memory_space<vmem>>, vector<1x8x1xf32>,
    %c3_131 = arith.constant 3 : index
    %c0_132 = arith.constant 0 : index
    %c0_133 = arith.constant 0 : index
    %160 = vector.load %arg11[%c3_131, %c0_132, %c0_133] : memref<4x8x32xf32, #tpu.memory_space<vmem>>, vector<1x8x32xf32>
    %161 = vector.shape_cast %160 : vector<1x8x32xf32> to vector<8x32xf32>
    %162 = vector.broadcast %147 : vector<8x1xf32> to vector<8x32xf32>
    %163 = arith.mulf %162, %161 : vector<8x32xf32>
    %cst_134 = arith.constant dense<0.000000e+00> : vector<8x32xf32>
    %164 = tpu.matmul %150, %138, %cst_134 {dimension_numbers = #tpu.dot_dimension_numbers<[1], [0], [0], [1], [0, 0, 1, 1], [], []>} : vector<8x8xf32>, vector<8x32xf32>, vector<8x32xf32> -> vector<8x32xf32>
    %165 = arith.addf %163, %164 : vector<8x32xf32>
    %c3_135 = arith.constant 3 : index
    %c0_136 = arith.constant 0 : index
    %c0_137 = arith.constant 0 : index
    %166 = vector.load %arg11[%c3_135, %c0_136, %c0_137] : memref<4x8x32xf32, #tpu.memory_space<vmem>>, vector<1x8x32xf32>
    %167 = vector.shape_cast %166 : vector<1x8x32xf32> to vector<8x32xf32>
    %168 = vector.shape_cast %165 : vector<8x32xf32> to vector<1x8x32xf32>
    tpu.vector_store %arg11[%c3_135, %c0_136, %c0_137], %168 {strides = array<i32>} : memref<4x8x32xf32, #tpu.memory_space<vmem>>, vector<1x8x32xf32>,
    %c3_138 = arith.constant 3 : index
    %c0_139 = arith.constant 0 : index
    %c0_140 = arith.constant 0 : index
    %169 = vector.load %arg9[%c3_138, %c0_139, %c0_140] : memref<4x8x1xf32, #tpu.memory_space<vmem>>, vector<1x8x1xf32>
    %170 = vector.shape_cast %169 : vector<1x8x1xf32> to vector<8x1xf32>
    %171 = vector.shape_cast %145 : vector<8x1xf32> to vector<1x8x1xf32>
    tpu.vector_store %arg9[%c3_138, %c0_139, %c0_140], %171 {strides = array<i32>} : memref<4x8x1xf32, #tpu.memory_space<vmem>>, vector<1x8x1xf32>,
    %c0_i32_141 = arith.constant 0 : i32
    %172 = arith.cmpi eq, %arg2, %c0_i32_141 : i32
    %173 = arith.extui %172 : i1 to i32
    %c0_i32_142 = arith.constant 0 : i32
    %174 = arith.cmpi ne, %173, %c0_i32_142 : i32
    scf.if %174 {
      %c0_143 = arith.constant 0 : index
      %c0_144 = arith.constant 0 : index
      %c0_145 = arith.constant 0 : index
      %175 = vector.load %arg10[%c0_143, %c0_144, %c0_145] : memref<4x8x1xf32, #tpu.memory_space<vmem>>, vector<1x8x1xf32>
      %176 = vector.shape_cast %175 : vector<1x8x1xf32> to vector<8x1xf32>
      %177 = tpu.reciprocal %176 {approx = true} : vector<8x1xf32> -> vector<8x1xf32>
      %178 = arith.mulf %176, %177 : vector<8x1xf32>
      %cst_146 = arith.constant 2.000000e+00 : f32
      %179 = vector.broadcast %cst_146 : f32 to vector<8x1xf32>
      %180 = arith.subf %179, %178 : vector<8x1xf32>
      %181 = arith.mulf %177, %180 : vector<8x1xf32>
      %c0_147 = arith.constant 0 : index
      %c0_148 = arith.constant 0 : index
      %c0_149 = arith.constant 0 : index
      %182 = vector.load %arg11[%c0_147, %c0_148, %c0_149] : memref<4x8x32xf32, #tpu.memory_space<vmem>>, vector<1x8x32xf32>
      %183 = vector.shape_cast %182 : vector<1x8x32xf32> to vector<8x32xf32>
      %184 = vector.broadcast %181 : vector<8x1xf32> to vector<8x32xf32>
      %185 = arith.mulf %183, %184 : vector<8x32xf32>
      %c1_150 = arith.constant 1 : index
      %c0_151 = arith.constant 0 : index
      %c0_152 = arith.constant 0 : index
      %186 = vector.load %arg10[%c1_150, %c0_151, %c0_152] : memref<4x8x1xf32, #tpu.memory_space<vmem>>, vector<1x8x1xf32>
      %187 = vector.shape_cast %186 : vector<1x8x1xf32> to vector<8x1xf32>
      %188 = tpu.reciprocal %187 {approx = true} : vector<8x1xf32> -> vector<8x1xf32>
      %189 = arith.mulf %187, %188 : vector<8x1xf32>
      %cst_153 = arith.constant 2.000000e+00 : f32
      %190 = vector.broadcast %cst_153 : f32 to vector<8x1xf32>
      %191 = arith.subf %190, %189 : vector<8x1xf32>
      %192 = arith.mulf %188, %191 : vector<8x1xf32>
      %c1_154 = arith.constant 1 : index
      %c0_155 = arith.constant 0 : index
      %c0_156 = arith.constant 0 : index
      %193 = vector.load %arg11[%c1_154, %c0_155, %c0_156] : memref<4x8x32xf32, #tpu.memory_space<vmem>>, vector<1x8x32xf32>
      %194 = vector.shape_cast %193 : vector<1x8x32xf32> to vector<8x32xf32>
      %195 = vector.broadcast %192 : vector<8x1xf32> to vector<8x32xf32>
      %196 = arith.mulf %194, %195 : vector<8x32xf32>
      %c2_157 = arith.constant 2 : index
      %c0_158 = arith.constant 0 : index
      %c0_159 = arith.constant 0 : index
      %197 = vector.load %arg10[%c2_157, %c0_158, %c0_159] : memref<4x8x1xf32, #tpu.memory_space<vmem>>, vector<1x8x1xf32>
      %198 = vector.shape_cast %197 : vector<1x8x1xf32> to vector<8x1xf32>
      %199 = tpu.reciprocal %198 {approx = true} : vector<8x1xf32> -> vector<8x1xf32>
      %200 = arith.mulf %198, %199 : vector<8x1xf32>
      %cst_160 = arith.constant 2.000000e+00 : f32
      %201 = vector.broadcast %cst_160 : f32 to vector<8x1xf32>
      %202 = arith.subf %201, %200 : vector<8x1xf32>
      %203 = arith.mulf %199, %202 : vector<8x1xf32>
      %c2_161 = arith.constant 2 : index
      %c0_162 = arith.constant 0 : index
      %c0_163 = arith.constant 0 : index
      %204 = vector.load %arg11[%c2_161, %c0_162, %c0_163] : memref<4x8x32xf32, #tpu.memory_space<vmem>>, vector<1x8x32xf32>
      %205 = vector.shape_cast %204 : vector<1x8x32xf32> to vector<8x32xf32>
      %206 = vector.broadcast %203 : vector<8x1xf32> to vector<8x32xf32>
      %207 = arith.mulf %205, %206 : vector<8x32xf32>
      %c3_164 = arith.constant 3 : index
      %c0_165 = arith.constant 0 : index
      %c0_166 = arith.constant 0 : index
      %208 = vector.load %arg10[%c3_164, %c0_165, %c0_166] : memref<4x8x1xf32, #tpu.memory_space<vmem>>, vector<1x8x1xf32>
      %209 = vector.shape_cast %208 : vector<1x8x1xf32> to vector<8x1xf32>
      %210 = tpu.reciprocal %209 {approx = true} : vector<8x1xf32> -> vector<8x1xf32>
      %211 = arith.mulf %209, %210 : vector<8x1xf32>
      %cst_167 = arith.constant 2.000000e+00 : f32
      %212 = vector.broadcast %cst_167 : f32 to vector<8x1xf32>
      %213 = arith.subf %212, %211 : vector<8x1xf32>
      %214 = arith.mulf %210, %213 : vector<8x1xf32>
      %c3_168 = arith.constant 3 : index
      %c0_169 = arith.constant 0 : index
      %c0_170 = arith.constant 0 : index
      %215 = vector.load %arg11[%c3_168, %c0_169, %c0_170] : memref<4x8x32xf32, #tpu.memory_space<vmem>>, vector<1x8x32xf32>
      %216 = vector.shape_cast %215 : vector<1x8x32xf32> to vector<8x32xf32>
      %217 = vector.broadcast %214 : vector<8x1xf32> to vector<8x32xf32>
      %218 = arith.mulf %216, %217 : vector<8x32xf32>
      %219 = tpu.concatenate %185, %196, %207, %218 in 1 : vector<8x32xf32>, vector<8x32xf32>, vector<8x32xf32>, vector<8x32xf32> -> vector<8x128xf32>
      %c0_171 = arith.constant 0 : index
      %c0_172 = arith.constant 0 : index
      %c0_173 = arith.constant 0 : index
      %220 = vector.load %arg8[%c0_171, %c0_172, %c0_173] : memref<1x8x128xf32, #tpu.memory_space<vmem>>, vector<1x8x128xf32>
      %221 = vector.shape_cast %220 : vector<1x8x128xf32> to vector<8x128xf32>
      %222 = vector.shape_cast %219 : vector<8x128xf32> to vector<1x8x128xf32>
      tpu.vector_store %arg8[%c0_171, %c0_172, %c0_173], %222 {strides = array<i32>} : memref<1x8x128xf32, #tpu.memory_space<vmem>>, vector<1x8x128xf32>,
    } else {
    }
    return
  }
  func.func @transform_0(%arg0: i32, %arg1: i32, %arg2: i32) -> (i32, i32, i32, i32) {
    %c0_i32 = arith.constant 0 : i32
    %c0_i32_0 = arith.constant 0 : i32
    %c0_i32_1 = arith.constant 0 : i32
    return %arg0, %arg1, %c0_i32, %c0_i32_0 : i32, i32, i32, i32
  }
  func.func @transform_1(%arg0: i32, %arg1: i32, %arg2: i32) -> (i32, i32, i32, i32) {
    %c0_i32 = arith.constant 0 : i32
    %c0_i32_0 = arith.constant 0 : i32
    %c0_i32_1 = arith.constant 0 : i32
    return %arg0, %arg2, %c0_i32, %c0_i32_0 : i32, i32, i32, i32
  }
  func.func @transform_2(%arg0: i32, %arg1: i32, %arg2: i32) -> (i32, i32, i32, i32) {
    %c0_i32 = arith.constant 0 : i32
    %c0_i32_0 = arith.constant 0 : i32
    %c0_i32_1 = arith.constant 0 : i32
    return %arg0, %arg2, %c0_i32, %c0_i32_0 : i32, i32, i32, i32
  }
  func.func @transform_3(%arg0: i32, %arg1: i32, %arg2: i32) -> (i32, i32) {
    %c0_i32 = arith.constant 0 : i32
    return %arg1, %arg2 : i32, i32
  }
  func.func @transform_4(%arg0: i32, %arg1: i32, %arg2: i32) -> (i32, i32, i32) {
    %c0_i32 = arith.constant 0 : i32
    %c0_i32_0 = arith.constant 0 : i32
    return %arg0, %c0_i32, %arg2 : i32, i32, i32
  }
  func.func @transform_5(%arg0: i32, %arg1: i32, %arg2: i32) -> (i32, i32, i32) {
    %c0_i32 = arith.constant 0 : i32
    %c0_i32_0 = arith.constant 0 : i32
    return %arg0, %arg1, %c0_i32 : i32, i32, i32
  }
}

</mosaic_0001>

<bundles_post_ra>
// kernel: tpu_custom_call.1
= control target key start
LH: loop header
LB: loop body
LE: loop exit
PB: predicated region body
PF: predicated region fallthrough
CT: control target
= control target key end

     0   :  { %s2903_s0 = inlined_call_operand.hbm [shape: f32[2,8,4,32], index: 0, kind: input, shape index: {}]   ;;  %s2904_s1 = inlined_call_operand.hbm [shape: f32[2,8,4,32], index: 1, kind: input, shape index: {}]   ;;  %s2905_s2 = inlined_call_operand.hbm [shape: f32[2,8,4,32], index: 2, kind: input, shape index: {}]   ;;  %s2906_s3 = inlined_call_operand.vmem [shape: f32[8,8], index: 3, kind: input, shape index: {}]   ;;  %s2907_s4 = inlined_call_operand.vmem [shape: f32[2,1,8], index: 4, kind: input, shape index: {}]   ;;  %s2908_s5 = inlined_call_operand.hbm [shape: f32[2,8,128], index: 5, kind: output, shape index: {}]  }
   0x1   :  { %2921 = sst [smem:[#allocation20_spill]] %s2904_s1 }
   0x2   :  { %10 = vsyncpa [#allocation6], 0 }
   0x3   :  { %12 = vsyncpa [#allocation6 + $0x1], 0 }
   0x4   :  { %13 = vsyncpa [#allocation9], 0 }
   0x5   :  { %15 = vsyncpa [#allocation9 + $0x1], 0 }
   0x6   :  { %16 = vsyncpa [#allocation7], 0 }
   0x7   :  { %18 = vsyncpa [#allocation7 + $0x1], 0  ;;  %s2242_s18 = smov 0   ;;  %s2244_s19 = smov 0  }
   0x8   :  { %s2246_s20 = smov 0   ;;  %s2248_s21 = smov 0  }
   0x9   :  { %s2250_s22 = smov 0   ;;  %s2252_s23 = smov 0  }
   0xa LB: > { %2922 = sst [smem:[#allocation15_spill]] %s2193_s22  ;;  %s2273_s24 = sadd.s32 4294967295, %s2197_s23   ;;  %s2197_s23 = sphi %s2252_s23, %s24_s23   ;;  %s2193_s22 = sphi %s2250_s22, %s2949_s22   ;;  %s2189_s21 = sphi %s2248_s21, %s2948_s21   ;;  %s2185_s20 = sphi %s2246_s20, %s2952_s20   ;;  %s2181_s19 = sphi %s2244_s19, %s2951_s19   ;;  %s2177_s18 = sphi %s2242_s18, %s2950_s18  }
   0xb   : > { %2923 = sst [smem:[#allocation16_spill]] %s2197_s23  ;;  %s1820_s25 = sadd.s32 4294967294, %s2197_s23  }
   0xc   : > { %s43_s26 = sadd.s32 1, %s2193_s22  ;;  %s52_s27 = sadd.s32 1, %s2185_s20 }
   0xd   : > { %p45_p0 = scmp.ge.s32.totalorder %s43_s26, 2  ;;  %p59_p1 = scmp.ne.s32.totalorder %s2185_s20, %s2181_s19 }
   0xe   : > { %p60_p2 = scmp.eq.s32.totalorder %s2197_s23, 0  ;;  %p65_p3 = scmp.ne.s32.totalorder %s2181_s19, %s2177_s18 }
   0xf   : > { %s2954_s26 = smov (%p45_p0, %s43_s26), 0  ;;  %p66_p5 = scmp.eq.s32.totalorder %s2273_s24, 0 }
  0x10   : > { %2924 = sst [smem:[#allocation17_spill]] %s2954_s26  ;;  %p2285_p4 = por %p60_p2, %p59_p1 }
  0x11   : > { %s47_s29 = ssub.s32 %s2193_s22, %s2954_s26  ;;  %p203_p6 = scmp.eq.s32.totalorder %s2273_s24, 1 }
  0x12   : > { %p50_p7 = scmp.eq.s32.totalorder %s47_s29, 0  ;;  %p2293_p8 = por %p66_p5, %p65_p3 }
  0x13   : > { %p2297_p9 = por %p203_p6, %p59_p1  ;;  %p209_p10 = scmp.eq.s32.totalorder %s1820_s25, 1 }
  0x14   : > { %s2926_s30 = scalar_select %p2293_p8, 1, 0 }
  0x15   : > { %s2927_s6 = scalar_select %p2297_p9, 1, 0 }
  0x16   : > { %s2302_s7 = scalar_select %p50_p7, %s2185_s20, %s52_s27  }
  0x17   : > { %p2304_p11 = por %p209_p10, %p65_p3  ;;  %p1936_p13 = scmp.lt.s32.totalorder %s2197_s23, 2 }
  0x18   : > { %2928 = sst [smem:[#allocation18_spill]] %s2302_s7  ;;  %s2909_s9 = sand.u32 1, %s2185_s20  }
  0x19   : > { %s2929_s8 = scalar_select %p2304_p11, 1, 0 }
  0x1a   : > { %s2313_s10 = sshll.u32 %s2909_s9, 5  ;;  %s2316_s11 = sshll.u32 %s2193_s22, 9 }
  0x1b   : > { %2930 = sst [smem:[#allocation19_spill]] %s2929_s8  ;;  %p2320_p0 = pnand %p1936_p13, %p2285_p4 }
  0x1c   : > { %s262_s13 = sand.u32 1, %s2197_s23   ;;  %s2932_s1 = sld [smem:[#allocation20_spill]] }
  0x1d   : > { %s266_s17 = scalar_lea.vmem [#allocation8], %s2313_s10  ;;  %s2336_s27 = scalar_lea.sflag [#allocation9], %s262_s13 }
  0x1e   : > { %s275_s25 = sshll.u32 %s266_s17, 4  ;;  %p2342_p4 = pneg %p2320_p0  ;;  %s2333_s25 = int_to_ptr.vmem [resolvable:$true] %s275_s25 }
  0x22   : > { %s2329_s16 = scalar_lea.hbm %s2932_s1, %s2316_s11  ;;  %s2026_s17 = scalar_lea.hbm %s2932_s1, 1024 }
  0x23   : > { %s2021_s28 = scalar_lea.hbm %s2329_s16, 512  ;;  %p2027_p7 = scmp.lt.u32.totalorder %s2329_s16, %s2932_s1 }
  0x24   : > { %p2022_p3 = scmp.ne.s32.totalorder %s2329_s16, %s2021_s28  ;;  %p2028_p10 = scmp.lt.u32.totalorder %s2026_s17, %s2021_s28 }
  0x25   : > { %p2030_p12 = scmp.lt.u32.totalorder %s2021_s28, %s2329_s16 }
  0x26   : > { %p2024_p5 = pnand %p2342_p4, %p2022_p3  ;;  %p2029_p13 = por %p2028_p10, %p2027_p7 }
  0x28   : > { %p2025_p6 = pneg %p2024_p5  ;;  %p2031_p1 = por %p2030_p12, %p2029_p13 }
  0x2a   : > { %p2032_p2 = pnand %p2031_p1, %p2025_p6 }
  0x2c   : > { %2035 = shalt.err (!%p2032_p2)
}
  0x2d   : > { %s2036_s13 = scalar_lea.vmem %s2333_s25, 512  ;;  %s2199_s14 = smov [#allocation8]  }
  0x2e   : > { %p2037_p3 = scmp.ne.s32.totalorder %s2333_s25, %s2036_s13  ;;  %s2041_s15 = sshll.u32 %s2199_s14, 4  ;;  %s2042_s15 = int_to_ptr.vmem [resolvable:$false] %s2041_s15 }
  0x2f   : > { %s2043_s26 = scalar_lea.vmem %s2042_s15, 1024  ;;  %p2044_p9 = scmp.lt.s32.totalorder %s2333_s25, %s2042_s15 }
  0x30   : > { %p2039_p5 = pnand %p2037_p3, %p2342_p4  ;;  %p2045_p8 = scmp.lt.s32.totalorder %s2043_s26, %s2036_s13 }
  0x32   : > { %p2040_p11 = pneg %p2039_p5  ;;  %p2046_p7 = por %p2045_p8, %p2044_p9 }
  0x34   : > { %p2047_p10 = pnand %p2046_p7, %p2040_p11 }
  0x36   : > { %2050 = shalt.err (!%p2047_p10)
}
  0x37   : > { %s2913_s9 = smov 64   ;;  %s2915_s28 = smov 4  }
  0x38   : > { %1928 = dma.hbm_to_vmem [thread:$0]  (!%p2320_p0), %s2329_s16, 512, %s2333_s25, %s2336_s27, %s2913_s9, %s2913_s9, %s2915_s28  }
  0x39   : > { %p2934_p8 = scmp.lt.s32.totalorder %s2197_s23, 3  ;;  %p2935_p9 = scmp.ge.s32.totalorder %s2197_s23, 1 }
  0x3a   : > { %s2381_s15 = scalar_lea.hbm %s2903_s0, %s2316_s11  ;;  %s243_s26 = scalar_lea.vmem [#allocation5], %s2313_s10 }
  0x3b   : > { %p2373_p11 = pnand %p2935_p9, %p2934_p8  ;;  %s252_s1 = sshll.u32 %s243_s26, 4  ;;  %s2384_s1 = int_to_ptr.vmem [resolvable:$true] %s252_s1 }
  0x3c   : > { %s2390_s9 = scalar_lea.hbm %s2905_s2, %s2316_s11  ;;  %s2937_s28 = sand.u32 1, %s2185_s20  }
  0x3d   : > { %s2936_s17 = scalar_select %p2373_p11, 1, 0 }
  0x3e   : > { %s2394_s22 = scalar_lea.sflag [#allocation6], %s2937_s28  ;;  %s2051_s7 = scalar_lea.hbm %s2381_s15, 512 }
  0x3f   : > { %p2052_p12 = scmp.ne.s32.totalorder %s2381_s15, %s2051_s7  ;;  %s2056_s23 = scalar_lea.hbm %s2903_s0, 1024 }
  0x40   : > { %p2057_p6 = scmp.lt.u32.totalorder %s2381_s15, %s2903_s0  ;;  %p2058_p13 = scmp.lt.u32.totalorder %s2056_s23, %s2051_s7 }
  0x41   : > { %p2054_p1 = pnand %p2052_p12, %p2342_p4  ;;  %p2060_p5 = scmp.lt.u32.totalorder %s2051_s7, %s2381_s15 }
  0x42   : > { %p2059_p3 = por %p2058_p13, %p2057_p6 }
  0x43   : > { %p2055_p2 = pneg %p2054_p1 }
  0x44   : > { %p2061_p7 = por %p2060_p5, %p2059_p3 }
  0x46   : > { %p2062_p10 = pnand %p2061_p7, %p2055_p2 }
  0x48   : > { %2065 = shalt.err (!%p2062_p10)
}
  0x49   : > { %s2066_s11 = scalar_lea.vmem %s2384_s1, 512  ;;  %s2202_s28 = smov [#allocation5]  }
  0x4a   : > { %p2067_p8 = scmp.ne.s32.totalorder %s2384_s1, %s2066_s11  ;;  %s2071_s16 = sshll.u32 %s2202_s28, 4  ;;  %s2072_s16 = int_to_ptr.vmem [resolvable:$false] %s2071_s16 }
  0x4b   : > { %s2073_s8 = scalar_lea.vmem %s2072_s16, 1024  ;;  %p2074_p1 = scmp.lt.s32.totalorder %s2384_s1, %s2072_s16 }
  0x4c   : > { %p2069_p9 = pnand %p2067_p8, %p2342_p4  ;;  %p2075_p11 = scmp.lt.s32.totalorder %s2073_s8, %s2066_s11 }
  0x4e   : > { %p2070_p12 = pneg %p2069_p9  ;;  %p2076_p6 = por %p2075_p11, %p2074_p1 }
  0x50   : > { %p2077_p13 = pnand %p2076_p6, %p2070_p12 }
  0x52   : > { %2080 = shalt.err (!%p2077_p13)
}
  0x53   : > { %s2938_s23 = smov 4   ;;  %s2939_s7 = smov 64  }
  0x54   : > { %1925 = dma.hbm_to_vmem [thread:$0]  (!%p2320_p0), %s2381_s15, 512, %s2384_s1, %s2394_s22, %s2939_s7, %s2939_s7, %s2938_s23  }
  0x55   : > { %s289_s25 = scalar_lea.vmem [#allocation10], %s2313_s10  ;;  %s2081_s14 = scalar_lea.hbm %s2390_s9, 512 }
  0x56   : > { %s298_s13 = sshll.u32 %s289_s25, 4  ;;  %p2082_p11 = scmp.ne.s32.totalorder %s2390_s9, %s2081_s14  ;;  %s2422_s13 = int_to_ptr.vmem [resolvable:$true] %s298_s13 }
  0x57   : > { %s2086_s28 = scalar_lea.hbm %s2905_s2, 1024  ;;  %p2087_p5 = scmp.lt.u32.totalorder %s2390_s9, %s2905_s2 }
  0x58   : > { %p2084_p2 = pnand %p2082_p11, %p2342_p4  ;;  %p2088_p7 = scmp.lt.u32.totalorder %s2086_s28, %s2081_s14 }
  0x59   : > { %p2090_p8 = scmp.lt.u32.totalorder %s2081_s14, %s2390_s9 }
  0x5a   : > { %p2085_p3 = pneg %p2084_p2  ;;  %p2089_p10 = por %p2088_p7, %p2087_p5 }
  0x5c   : > { %p2091_p9 = por %p2090_p8, %p2089_p10 }
  0x5e   : > { %p2092_p12 = pnand %p2091_p9, %p2085_p3 }
  0x60   : > { %2095 = shalt.err (!%p2092_p12)
}
  0x61   : > { %s2096_s1 = scalar_lea.vmem %s2422_s13, 512  ;;  %s2203_s22 = smov [#allocation10]  }
  0x62   : > { %p2097_p1 = scmp.ne.s32.totalorder %s2422_s13, %s2096_s1  ;;  %s2101_s10 = sshll.u32 %s2203_s22, 4  ;;  %s2102_s10 = int_to_ptr.vmem [resolvable:$false] %s2101_s10 }
  0x63   : > { %s2103_s15 = scalar_lea.vmem %s2102_s10, 1024  ;;  %p2104_p11 = scmp.lt.s32.totalorder %s2422_s13, %s2102_s10 }
  0x64   : > { %p2099_p6 = pnand %p2097_p1, %p2342_p4  ;;  %p2105_p2 = scmp.lt.s32.totalorder %s2103_s15, %s2096_s1 }
  0x66   : > { %p2100_p13 = pneg %p2099_p6  ;;  %p2106_p5 = por %p2105_p2, %p2104_p11 }
  0x68   : > { %p2107_p7 = pnand %p2106_p5, %p2100_p13 }
  0x6a   : > { %2110 = shalt.err (!%p2107_p7)
}
  0x6b   : > { %1931 = dma.hbm_to_vmem [thread:$0]  (!%p2320_p0), %s2390_s9, 512, %s2422_s13, %s2336_s27, %s2939_s7, %s2939_s7, %s2938_s23  }
  0x6c   : > { %p2940_p4 = scmp.ne.s32.totalorder %s2936_s17, 0 }
  0x6d   : > { %s2452_s29 = sand.u32 (!%p2940_p4), 1, %s2181_s19   ;;  %p2941_p3 = scmp.ne.s32.totalorder (!%p2940_p4), %s2926_s30, 0 }
  0x6e   : > { %319 = sbr.rel (%p2940_p4) target bundleno = 1588 (0x634), region = 40  ;;  %s2455_s25 = sshll.u32 (!%p2940_p4), %s2452_s29, 5 }
  0x6f   : > { %s322_s12 = scalar_lea.sflag (!%p2940_p4), [#allocation6], %s2452_s29  ;;  %s2459_s14 = scalar_lea.vmem (!%p2940_p4), [#allocation5], %s2455_s25 }
  0x75   : > { %2164 = dma.done.wait (%p2941_p3), %s322_s12, 512  }
  0x76   : > { %2166 = vsyncadd (%p2941_p3), %s322_s12, 4294966784  ;;  %s330_s27 = sand.u32 1, %s2273_s24   ;;  %s2467_s17 = scalar_lea.vmem [#allocation8], %s2455_s25 }
  0x77   : > { %s331_s9 = scalar_lea.sflag [#allocation9], %s330_s27 }
  0x78   : > { %2168 = dma.done.wait (%p2941_p3), %s331_s9, 1024  }
  0x79   : > { %2170 = vsyncadd (%p2941_p3), %s331_s9, 4294966272  ;;  %vm422_vm0 = vcmask 261120   ;;  %v2204_v0 = vmov 0.0   ;;  %vm2205_vm1 = vmmov 0   ;;  %vm477_vm2 = vcmask 1041409   ;;  %p403_p0 = scmp.lt.s32.totalorder %s2189_s21, 1 }
  0x7a   : > { %1874 = vmatprep.subr.mxu0 %v2204_v0  ;;  %423 = vst.msk [vmem:[#allocation4] sm:$0xff] %vm422_vm0, %v2204_v0  ;;  %424 = vst.msk [vmem:[#allocation4 + $0x8] sm:$0xff] %vm422_vm0, %v2204_v0  ;;  %1879 = vmatprep.subr.mxu1 %v2204_v0  ;;  %vm480_vm3 = vcmask 1042434   ;;  %vm483_vm4 = vcmask 1043459   ;;  %vm486_vm5 = vcmask 1044484   ;;  %vm489_vm6 = vcmask 1045509  }
  0x7b   : > { %425 = vst.msk [vmem:[#allocation4 + $0x10] sm:$0xff] %vm422_vm0, %v2204_v0  ;;  %426 = vst.msk [vmem:[#allocation4 + $0x18] sm:$0xff] %vm422_vm0, %v2204_v0  ;;  %1876 = vmatprep.mubr.msk.f32.mxu0 %vm2205_vm1, %v2204_v0  ;;  %1881 = vmatprep.mubr.msk.f32.mxu1 %vm2205_vm1, %v2204_v0  ;;  %vm492_vm7 = vcmask 1046534   ;;  %v452_v1 = vld [vmem:[%s2467_s17] sm:$0x1]  ;;  %vm495_vm8 = vcmask 1047559  }
  0x7c   : > { %v453_v2 = vld [vmem:[%s2467_s17 + $0x4] sm:$0x1]  ;;  %v454_v3 = vld [vmem:[%s2467_s17 + $0x8] sm:$0x1]  ;;  %v455_v4 = vld [vmem:[%s2467_s17 + $0xc] sm:$0x1] }
  0x7d   : > { %v456_v5 = vld [vmem:[%s2467_s17 + $0x10] sm:$0x1]  ;;  %v457_v6 = vld [vmem:[%s2467_s17 + $0x14] sm:$0x1]  ;;  %v458_v7 = vld [vmem:[%s2467_s17 + $0x18] sm:$0x1] }
  0x7e   : > { %v459_v8 = vld [vmem:[%s2467_s17 + $0x1c] sm:$0x1]  ;;  %v505_v9 = vrot.slane %v453_v2, 7  ;;  %v507_v10 = vrot.slane %v454_v3, 6  ;;  %v509_v11 = vrot.slane %v455_v4, 5  ;;  %v511_v12 = vrot.slane %v456_v5, 4 }
  0x7f   : > { %v513_v13 = vrot.slane %v457_v6, 3  ;;  %v436_v14 = vld [vmem:[%s2459_s14] sm:$0x1]  ;;  %v515_v16 = vrot.slane %v458_v7, 2  ;;  %v517_v17 = vrot.slane %v459_v8, 1  ;;  %vm413_vm9 = vcmask 7168  }
  0x80   : > { %v506_v15 = vsel %vm477_vm2, %v505_v9, %v452_v1  ;;  %v437_v18 = vld [vmem:[%s2459_s14 + $0x4] sm:$0x1]  ;;  %v438_v19 = vld [vmem:[%s2459_s14 + $0x8] sm:$0x1]  ;;  %v439_v21 = vld [vmem:[%s2459_s14 + $0xc] sm:$0x1] }
  0x81   : > { %v508_v20 = vsel %vm480_vm3, %v507_v10, %v506_v15  ;;  %v440_v22 = vld [vmem:[%s2459_s14 + $0x10] sm:$0x1]  ;;  %v441_v23 = vld [vmem:[%s2459_s14 + $0x14] sm:$0x1]  ;;  %v442_v25 = vld [vmem:[%s2459_s14 + $0x18] sm:$0x1] }
  0x82   : > { %v510_v24 = vsel %vm483_vm4, %v509_v11, %v508_v20  ;;  %v443_v26 = vld [vmem:[%s2459_s14 + $0x1c] sm:$0x1]  ;;  %v444_v27 = vmul.f32 0.17677669, %v436_v14  ;;  %v445_v29 = vmul.f32 0.17677669, %v437_v18 }
  0x83   : > { %v512_v28 = vsel %vm486_vm5, %v511_v12, %v510_v24  ;;  %v446_v30 = vmul.f32 0.17677669, %v438_v19  ;;  %v447_v31 = vmul.f32 0.17677669, %v439_v21  ;;  %v448_v33 = vmul.f32 0.17677669, %v440_v22 }
  0x84   : > { %v514_v32 = vsel %vm489_vm6, %v513_v13, %v512_v28  ;;  %v449_v34 = vmul.f32 0.17677669, %v441_v23  ;;  %v450_v35 = vmul.f32 0.17677669, %v442_v25  ;;  %v451_v37 = vmul.f32 0.17677669, %v443_v26 }
  0x85   : > { %v516_v36 = vsel %vm492_vm7, %v515_v16, %v514_v32  ;;  %v476_v38 = vrot.slane %v445_v29, 7  ;;  %v479_v39 = vrot.slane %v446_v30, 6  ;;  %v482_v41 = vrot.slane %v447_v31, 5  ;;  %418 = vst.msk [vmem:[#allocation3] sm:$0xff] %vm413_vm9, %v2204_v0  ;;  %419 = vst.msk [vmem:[#allocation3 + $0x8] sm:$0xff] %vm413_vm9, %v2204_v0  ;;  %s404_s24 = scalar_select %p403_p0, %s2189_s21, 1 }
  0x86   : > { %v518_v40 = vsel %vm495_vm8, %v517_v17, %v516_v36  ;;  %v485_v42 = vrot.slane %v448_v33, 4  ;;  %v488_v44 = vrot.slane %v449_v34, 3  ;;  %v491_v46 = vrot.slane %v450_v35, 2  ;;  %420 = vst.msk [vmem:[#allocation3 + $0x10] sm:$0xff] %vm413_vm9, %v2204_v0  ;;  %421 = vst.msk [vmem:[#allocation3 + $0x18] sm:$0xff] %vm413_vm9, %v2204_v0  ;;  %v427_v54 = vld [vmem:[%s2906_s3] sm:$0xff] }
  0x87   : > { %1875 = vmatpush3.xpose.msk.msra.mxu0 %vm422_vm0, %v518_v40  ;;  %v478_v43 = vsel %vm477_vm2, %v476_v38, %v444_v27  ;;  %v494_v48 = vrot.slane %v451_v37, 1  ;;  %v2206_v53 = vmov -inf   ;;  %s408_s7 = scalar_lea.vmem %s2907_s4, %s404_s24  ;;  %vm595_vm10 = vcmask 64512   ;;  %s2555_s11 = scalar_lea.vmem [#allocation10], %s2455_s25  ;;  %v742_v25 = vld [vmem:[%s2467_s17 + $0x5] sm:$0x1] }
  0x88   : > { %v481_v45 = vsel %vm480_vm3, %v479_v39, %v478_v43  ;;  %1889 = vmatprep.subr.mxu0 %v2204_v0  ;;  %414 = vst.msk [vmem:[#allocation2] sm:$0xff] %vm413_vm9, %v2206_v53  ;;  %415 = vst.msk [vmem:[#allocation2 + $0x8] sm:$0xff] %vm413_vm9, %v2206_v53  ;;  %v1838_v55 = vld [vmem:[%s408_s7] ss:$0 sm:$0xff]  ;;  %v2207_v61 = vmov 0   ;;  %v787_v31 = vrot.slane %v742_v25, 7 }
  0x89   : > { %v484_v47 = vsel %vm483_vm4, %v482_v41, %v481_v45  ;;  %416 = vst.msk [vmem:[#allocation2 + $0x10] sm:$0xff] %vm413_vm9, %v2206_v53  ;;  %417 = vst.msk [vmem:[#allocation2 + $0x18] sm:$0xff] %vm413_vm9, %v2206_v53  ;;  %v2542_v56 = vadd.f32 %v1838_v55, %v427_v54  ;;  %1995 = vset.pattern.permute.xlu0 %v2207_v61  ;;  %1996 = vset.pattern.permute.xlu1 %v2207_v61  ;;  %v461_v2 = vld [vmem:[%s2555_s11 + $0x4] sm:$0x1]  ;;  %v462_v4 = vld [vmem:[%s2555_s11 + $0x8] sm:$0x1] }
  0x8a   : > { %v487_v49 = vsel %vm486_vm5, %v485_v42, %v484_v47  ;;  %v634_v5 = vrot.slane %v461_v2, 7  ;;  %v460_v6 = vld [vmem:[%s2555_s11] sm:$0x1]  ;;  %v463_v7 = vld [vmem:[%s2555_s11 + $0xc] sm:$0x1]  ;;  %v636_v8 = vrot.slane %v462_v4, 6 }
  0x8b   : > { %v490_v50 = vsel %vm489_vm6, %v488_v44, %v487_v49  ;;  %v464_v9 = vld [vmem:[%s2555_s11 + $0x10] sm:$0x1]  ;;  %v638_v11 = vrot.slane %v463_v7, 5  ;;  %v465_v12 = vld [vmem:[%s2555_s11 + $0x14] sm:$0x1]  ;;  %s2208_s28 = smov 32  }
  0x8c   : > { %v493_v51 = vsel %vm492_vm7, %v491_v46, %v490_v50  ;;  %v635_v10 = vsel %vm477_vm2, %v634_v5, %v460_v6  ;;  %v640_v14 = vrot.slane %v464_v9, 4  ;;  %v466_v15 = vld [vmem:[%s2555_s11 + $0x18] sm:$0x1]  ;;  %v467_v16 = vld [vmem:[%s2555_s11 + $0x1c] sm:$0x1]  ;;  %v642_v18 = vrot.slane %v465_v12, 3 }
  0x8d   : > { %v496_v52 = vsel %vm495_vm8, %v494_v48, %v493_v51  ;;  %v637_v13 = vsel %vm480_vm3, %v636_v8, %v635_v10  ;;  %v644_v20 = vrot.slane %v466_v15, 2  ;;  %v646_v21 = vrot.slane %v467_v16, 1  ;;  %v743_v26 = vld [vmem:[%s2467_s17 + $0x9] sm:$0x1]  ;;  %v744_v27 = vld [vmem:[%s2467_s17 + $0xd] sm:$0x1] }
  0x8e   : > { %1877 = vmatmul.mubr.msk.f32.vlgmr.msra.gmra.mrb[0].mxu0 %vm422_vm0, %v496_v52  ;;  %v639_v17 = vsel %vm483_vm4, %v638_v11, %v637_v13  ;;  %v745_v28 = vld [vmem:[%s2467_s17 + $0x11] sm:$0x1]  ;;  %v2583_v29 = vld [vmem:[%s2467_s17 + $0x15] sm:$0x1]  ;;  %v741_v30 = vld [vmem:[%s2467_s17 + $0x1] sm:$0x1] }
  0x8f   : > { %1891 = vmatprep.mubr.msk.f32.mxu0 %vm2205_vm1, %v2204_v0  ;;  %v2549_v62 = vld [vmem:[#allocation2] sm:$0xff]  ;;  %v641_v19 = vsel %vm486_vm5, %v640_v14, %v639_v17  ;;  %v789_v33 = vrot.slane %v743_v26, 6  ;;  %v791_v34 = vrot.slane %v744_v27, 5  ;;  %v727_v36 = vld [vmem:[%s2459_s14 + $0x9] sm:$0x1]  ;;  %v793_v38 = vrot.slane %v745_v28, 4 }
  0x90   : > { %v643_v22 = vsel %vm489_vm6, %v642_v18, %v641_v19  ;;  %v726_v32 = vld [vmem:[%s2459_s14 + $0x5] sm:$0x1]  ;;  %v725_v35 = vld [vmem:[%s2459_s14 + $0x1] sm:$0x1]  ;;  %v2590_v37 = vld [vmem:[%s2467_s17 + $0x19] sm:$0x1]  ;;  %v788_v48 = vsel %vm477_vm2, %v787_v31, %v741_v30 }
  0x91   : > { %v645_v23 = vsel %vm492_vm7, %v644_v20, %v643_v22  ;;  %v795_v39 = vrot.slane %v2583_v29, 3  ;;  %v728_v40 = vld [vmem:[%s2459_s14 + $0xd] sm:$0x1]  ;;  %v2595_v41 = vld [vmem:[%s2467_s17 + $0x1d] sm:$0x1]  ;;  %v797_v55 = vrot.slane %v2590_v37, 2  ;;  %v790_v61 = vsel %vm480_vm3, %v789_v33, %v788_v48 }
  0x92   : > { %v647_v24 = vsel %vm495_vm8, %v646_v21, %v645_v23  ;;  %v729_v42 = vld [vmem:[%s2459_s14 + $0x11] sm:$0x1]  ;;  %v730_v43 = vld [vmem:[%s2459_s14 + $0x15] sm:$0x1]  ;;  %v734_v44 = vmul.f32 0.17677669, %v726_v32  ;;  %v792_v14 = vsel %vm483_vm4, %v791_v34, %v790_v61 }
  0x93   : > { %1880 = vmatpush3.msra.mxu1 %v647_v24  ;;  %v731_v45 = vld [vmem:[%s2459_s14 + $0x19] sm:$0x1]  ;;  %v732_v46 = vld [vmem:[%s2459_s14 + $0x1d] sm:$0x1]  ;;  %v735_v47 = vmul.f32 0.17677669, %v727_v36  ;;  %v794_v28 = vsel %vm486_vm5, %v793_v38, %v792_v14 }
  0x94   : > { %1884 = vmatprep.subr.mxu1 %v2204_v0  ;;  %v733_v49 = vmul.f32 0.17677669, %v725_v35  ;;  %v736_v50 = vmul.f32 0.17677669, %v728_v40  ;;  %v1008_v51 = vld [vmem:[%s2459_s14 + $0x6] sm:$0x1] }
  0x95   : > { %v2603_v52 = vmul.f32 0.17677669, %v729_v42  ;;  %v2605_v53 = vmul.f32 0.17677669, %v730_v43  ;;  %v1024_v54 = vld [vmem:[%s2467_s17 + $0x6] sm:$0x1] }
  0x96   : > { %v767_v2 = vrot.slane %v735_v47, 6  ;;  %v1009_v4 = vld [vmem:[%s2459_s14 + $0xa] sm:$0x1]  ;;  %v1016_v5 = vmul.f32 0.17677669, %v1008_v51  ;;  %v769_v6 = vrot.slane %v736_v50, 5 }
  0x97   : > { %v1025_v7 = vld [vmem:[%s2467_s17 + $0xa] sm:$0x1]  ;;  %v1069_v8 = vrot.slane %v1024_v54, 7  ;;  %v1007_v9 = vld [vmem:[%s2459_s14 + $0x2] sm:$0x1]  ;;  %v771_v10 = vrot.slane %v2603_v52, 4 }
  0x98   : > { %v773_v11 = vrot.slane %v2605_v53, 3  ;;  %v1023_v12 = vld [vmem:[%s2467_s17 + $0x2] sm:$0x1]  ;;  %v1290_v13 = vld [vmem:[%s2459_s14 + $0x7] sm:$0x1]  ;;  %v1071_v19 = vrot.slane %v1025_v7, 6 }
  0x99   : > { %v1026_v16 = vld [vmem:[%s2467_s17 + $0xe] sm:$0x1]  ;;  %v1017_v17 = vmul.f32 0.17677669, %v1009_v4  ;;  %v1306_v18 = vld [vmem:[%s2467_s17 + $0x7] sm:$0x1]  ;;  %v1070_v23 = vsel %vm477_vm2, %v1069_v8, %v1023_v12 }
  0x9a   : > { %v1010_v20 = vld [vmem:[%s2459_s14 + $0xe] sm:$0x1]  ;;  %v1015_v21 = vmul.f32 0.17677669, %v1007_v9  ;;  %v1047_v22 = vrot.slane %v1016_v5, 7  ;;  %v1351_v34 = vrot.slane %v1306_v18, 7 }
  0x9b   : > { %v1011_v24 = vld [vmem:[%s2459_s14 + $0x12] sm:$0x1]  ;;  %v1291_v25 = vld [vmem:[%s2459_s14 + $0xb] sm:$0x1]  ;;  %v1298_v26 = vmul.f32 0.17677669, %v1290_v13 }
  0x9c   : > { %v1027_v32 = vld [vmem:[%s2467_s17 + $0x12] sm:$0x1]  ;;  %v1307_v33 = vld [vmem:[%s2467_s17 + $0xb] sm:$0x1]  ;;  %v1289_v35 = vld [vmem:[%s2459_s14 + $0x3] sm:$0x1]  ;;  %v1048_v38 = vsel %vm477_vm2, %v1047_v22, %v1015_v21 }
  0x9d   : > { %v1073_v40 = vrot.slane %v1026_v16, 5  ;;  %v1018_v42 = vmul.f32 0.17677669, %v1010_v20  ;;  %v1049_v43 = vrot.slane %v1017_v17, 6  ;;  %v1292_v47 = vld [vmem:[%s2459_s14 + $0xf] sm:$0x1] }
  0x9e   : > { %v1299_v48 = vmul.f32 0.17677669, %v1291_v25  ;;  %v1353_v50 = vrot.slane %v1307_v33, 6  ;;  %v1297_v51 = vmul.f32 0.17677669, %v1289_v35  ;;  %v1329_v52 = vrot.slane %v1298_v26, 7 }
  0x9f   : > { %v1012_v61 = vld [vmem:[%s2459_s14 + $0x16] sm:$0x1]  ;;  %v1075_v5 = vrot.slane %v1027_v32, 4  ;;  %v1051_v7 = vrot.slane %v1018_v42, 5  ;;  %v1293_v8 = vld [vmem:[%s2459_s14 + $0x13] sm:$0x1]  ;;  %v1050_v29 = vsel %vm480_vm3, %v1049_v43, %v1048_v38 }
  0xa0   : > { %v1300_v9 = vmul.f32 0.17677669, %v1292_v47  ;;  %v1331_v13 = vrot.slane %v1299_v48, 6  ;;  %v1013_v16 = vld [vmem:[%s2459_s14 + $0x1a] sm:$0x1]  ;;  %s2209_s16 = smov 64  }
  0xa1   : > { %v1020_v17 = vmul.f32 0.17677669, %v1012_v61  ;;  %v1310_v25 = vld [vmem:[%s2467_s17 + $0x17] sm:$0x1]  ;;  %v1014_v32 = vld [vmem:[%s2459_s14 + $0x1e] sm:$0x1] }
  0xa2   : > { %v1295_v42 = vld [vmem:[%s2459_s14 + $0x1b] sm:$0x1]  ;;  %v1022_v47 = vmul.f32 0.17677669, %v1014_v32  ;;  %v2735_v32 = vld [vmem:[#allocation2 + $0x8] sm:$0xff]  ;;  %s2210_s8 = smov 96  }
  0xa3   : > { %s1837_s1 = sshll.u32 %s2452_s29, 3  ;;  %vm1635_vm11 = vcmask 523264   ;;  %s1852_s22 = sshll.u32 %s2189_s21, 7  ;;  %vm1637_vm12 = vcmask 785408  }
  0xa4   : > { %s392_s10 = scalar_lea.vmem [#allocation11], %s1837_s1  ;;  %s1641_s21 = scalar_lea.sflag [#allocation7], %s2452_s29 }
  0xa5   : > { %s1655_s15 = sshll.u32 %s392_s10, 4  ;;  %p2942_p8 = scmp.ne.s32.totalorder %s2927_s6, 0  ;;  %s2856_s15 = int_to_ptr.vmem [resolvable:$true] %s1655_s15 }
  0xa6   : > { %s2111_s27 = scalar_lea.vmem %s2856_s15, 128  ;;  %s2211_s9 = smov [#allocation11]  }
  0xa7   : > { %p2112_p10 = scmp.ne.s32.totalorder %s2856_s15, %s2111_s27 }
  0xa9   : > { %p2113_p9 = pnand %p2112_p10, %p2942_p8 }
  0xab   : > { %p2114_p12 = pneg %p2113_p9 }
 0x161   : > { %v590_v57 = vpop.f32.mrb[0].mxu0 }
 0x162   : > { %v2545_v58 = vadd.f32 %v590_v57, %v2542_v56  ;;  %v1878_v59 = vpop.f32.mrb[1].mxu0  ;;  %v2609_v57 = vmul.f32 0.17677669, %v731_v45  ;;  %v1072_v45 = vsel %vm480_vm3, %v1071_v19, %v1070_v23  ;;  %v1330_v19 = vsel %vm477_vm2, %v1329_v52, %v1297_v51  ;;  %v1294_v23 = vld [vmem:[%s2459_s14 + $0x17] sm:$0x1] }
 0x163   : > { %v2611_v59 = vmul.f32 0.17677669, %v732_v46  ;;  %v1308_v46 = vld [vmem:[%s2467_s17 + $0xf] sm:$0x1]  ;;  %v1074_v12 = vsel %vm483_vm4, %v1073_v40, %v1072_v45  ;;  %v1055_v40 = vrot.slane %v1020_v17, 3  ;;  %v1359_v45 = vrot.slane %v1310_v25, 3 }
 0x164   : > { %v596_v60 = vsel %vm595_vm10, %v2545_v58, -inf  ;;  %v775_v31 = vrot.slane %v2609_v57, 2  ;;  %v1076_v37 = vsel %vm486_vm5, %v1075_v5, %v1074_v12  ;;  %v1302_v43 = vmul.f32 0.17677669, %v1294_v23  ;;  %v1296_v51 = vld [vmem:[%s2459_s14 + $0x1f] sm:$0x1]  ;;  %s2854_s14 = scalar_lea.hbm %s2908_s5, %s1852_s22 }
 0x165   : > { %597 = vmax.xlane.f32.xlu0 %v596_v60  ;;  %v765_v60 = vrot.slane %v734_v44, 7  ;;  %v1305_v44 = vld [vmem:[%s2467_s17 + $0x3] sm:$0x1]  ;;  %v1303_v52 = vmul.f32 0.17677669, %v1295_v42  ;;  %v1059_v5 = vrot.slane %v1022_v47, 1 }
 0x166   : > { %v1352_v4 = vsel %vm477_vm2, %v1351_v34, %v1305_v44  ;;  %v1332_v34 = vsel %vm480_vm3, %v1331_v13, %v1330_v19  ;;  %v1311_v44 = vld [vmem:[%s2467_s17 + $0x1b] sm:$0x1]  ;;  %v753_v47 = vld [vmem:[%s2555_s11 + $0x11] sm:$0x1] }
 0x167   : > { %v766_v15 = vsel %vm477_vm2, %v765_v60, %v733_v49  ;;  %v1028_v60 = vld [vmem:[%s2467_s17 + $0x16] sm:$0x1]  ;;  %v1354_v18 = vsel %vm480_vm3, %v1353_v50, %v1352_v4  ;;  %v1361_v61 = vrot.slane %v1311_v44, 2 }
 0x168   : > { %v768_v30 = vsel %vm480_vm3, %v767_v2, %v766_v15  ;;  %v1019_v2 = vmul.f32 0.17677669, %v1011_v24  ;;  %v1029_v15 = vld [vmem:[%s2467_s17 + $0x1a] sm:$0x1]  ;;  %v1077_v21 = vrot.slane %v1028_v60, 3 }
 0x169   : > { %v770_v54 = vsel %vm483_vm4, %v769_v6, %v768_v30  ;;  %v1355_v6 = vrot.slane %v1308_v46, 5  ;;  %v1301_v24 = vmul.f32 0.17677669, %v1293_v8  ;;  %v1030_v30 = vld [vmem:[%s2467_s17 + $0x1e] sm:$0x1]  ;;  %v777_v46 = vrot.slane %v2611_v59, 1 }
 0x16a   : > { %v772_v20 = vsel %vm486_vm5, %v771_v10, %v770_v54  ;;  %v1053_v22 = vrot.slane %v1019_v2, 4  ;;  %v1021_v10 = vmul.f32 0.17677669, %v1013_v16  ;;  %v1312_v59 = vld [vmem:[%s2467_s17 + $0x1f] sm:$0x1]  ;;  %v1337_v2 = vrot.slane %v1302_v43, 3 }
 0x16b   : > { %v1356_v33 = vsel %vm483_vm4, %v1355_v6, %v1354_v18  ;;  %v774_v35 = vsel %vm489_vm6, %v773_v11, %v772_v20  ;;  %v1335_v38 = vrot.slane %v1301_v24, 4  ;;  %v1363_v12 = vrot.slane %v1312_v59, 1  ;;  %v750_v43 = vld [vmem:[%s2555_s11 + $0x5] sm:$0x1]  ;;  %v756_v59 = vld [vmem:[%s2555_s11 + $0x1d] sm:$0x1] }
 0x16c   : > { %v776_v48 = vsel %vm492_vm7, %v775_v31, %v774_v35  ;;  %v1057_v50 = vrot.slane %v1021_v10, 2  ;;  %v916_v44 = vrot.slane %v750_v43, 7 }
 0x16d   : > { %v778_v4 = vsel %vm495_vm8, %v777_v46, %v776_v48  ;;  %v752_v46 = vld [vmem:[%s2555_s11 + $0xd] sm:$0x1] }
 0x16e   : > { %v920_v48 = vrot.slane %v752_v46, 5 }
 0x1f2   : > { %v598_v63 = vpop.xlane.xlu0 %597 }
 0x1f3   : > { %v2552_v1 = vmax.f32 %v2549_v62, %v598_v63  ;;  %v799_v63 = vrot.slane %v2595_v41, 1  ;;  %v1078_v41 = vsel %vm489_vm6, %v1077_v21, %v1076_v37 }
 0x1f5   : > { %v600_v3 = vsub.f32 %v2549_v62, %v2552_v1  ;;  %724 = vst.msk [vmem:[#allocation2] sm:$0xff] %vm413_vm9, %v2552_v1  ;;  %605 = vperm.xlu0 %1995, %v2552_v1  }
 0x274   : > { %v606_v27 = vpop.permute.xlu0 %605 }
 0x275   : > { %v608_v36 = vsub.f32 %v2545_v58, %v606_v27  ;;  %v796_v58 = vsel %vm489_vm6, %v795_v39, %v794_v28  ;;  %v1309_v39 = vld [vmem:[%s2467_s17 + $0x13] sm:$0x1]  ;;  %v1333_v27 = vrot.slane %v1300_v9, 5  ;;  %s2115_s17 = sshll.u32 %s2211_s9, 4  ;;  %s2116_s17 = int_to_ptr.vmem [resolvable:$false] %s2115_s17 }
 0x276   : > { %v798_v14 = vsel %vm492_vm7, %v797_v55, %v796_v58  ;;  %v1052_v55 = vsel %vm483_vm4, %v1051_v7, %v1050_v29  ;;  %v1357_v26 = vrot.slane %v1309_v39, 4  ;;  %v1304_v7 = vmul.f32 0.17677669, %v1296_v51  ;;  %s2117_s24 = scalar_lea.vmem %s2116_s17, 256  ;;  %p2118_p1 = scmp.lt.s32.totalorder %s2856_s15, %s2116_s17 }
 0x277   : > { %v609_v49 = vmul.f32 1.442695, %v608_v36  ;;  %v800_v28 = vsel %vm495_vm8, %v799_v63, %v798_v14  ;;  %v1079_v36 = vrot.slane %v1029_v15, 2  ;;  %v1054_v63 = vsel %vm486_vm5, %v1053_v22, %v1052_v55  ;;  %p2119_p6 = scmp.lt.s32.totalorder %s2117_s24, %s2111_s27 }
 0x278   : > { %v1358_v53 = vsel %vm486_vm5, %v1357_v26, %v1356_v33  ;;  %v1334_v11 = vsel %vm483_vm4, %v1333_v27, %v1332_v34  ;;  %v1056_v60 = vsel %vm489_vm6, %v1055_v40, %v1054_v63  ;;  %v1339_v29 = vrot.slane %v1303_v52, 2  ;;  %v2740_v34 = vld [vmem:[#allocation2 + $0x10] sm:$0xff]  ;;  %v2750_v40 = vld [vmem:[#allocation2 + $0x18] sm:$0xff]  ;;  %v751_v63 = vld [vmem:[%s2555_s11 + $0x9] sm:$0x1] }
 0x279   : > { %1997 = vpow2.f32 %v609_v49  ;;  %v1081_v49 = vrot.slane %v1030_v30, 1  ;;  %v1080_v54 = vsel %vm492_vm7, %v1079_v36, %v1078_v41  ;;  %v1360_v57 = vsel %vm489_vm6, %v1359_v45, %v1358_v53  ;;  %v755_v52 = vld [vmem:[%s2555_s11 + $0x19] sm:$0x1]  ;;  %p2120_p13 = por %p2119_p6, %p2118_p1 }
 0x27a   : > { %v1336_v31 = vsel %vm486_vm5, %v1335_v38, %v1334_v11  ;;  %v1058_v9 = vsel %vm492_vm7, %v1057_v50, %v1056_v60  ;;  %v1362_v39 = vsel %vm492_vm7, %v1361_v61, %v1360_v57  ;;  %v1341_v14 = vrot.slane %v1304_v7, 1  ;;  %v749_v38 = vld [vmem:[%s2555_s11 + $0x1] sm:$0x1]  ;;  %v754_v50 = vld [vmem:[%s2555_s11 + $0x15] sm:$0x1] }
 0x27b   : > { %v1082_v8 = vsel %vm495_vm8, %v1081_v49, %v1080_v54  ;;  %v1338_v6 = vsel %vm489_vm6, %v1337_v2, %v1336_v31  ;;  %v1060_v13 = vsel %vm495_vm8, %v1059_v5, %v1058_v9  ;;  %v1364_v15 = vsel %vm495_vm8, %v1363_v12, %v1362_v39  ;;  %v1032_v9 = vld [vmem:[%s2555_s11 + $0x6] sm:$0x1]  ;;  %v1033_v12 = vld [vmem:[%s2555_s11 + $0xa] sm:$0x1]  ;;  %v1031_v39 = vld [vmem:[%s2555_s11 + $0x2] sm:$0x1]  ;;  %p2121_p11 = pnand %p2120_p13, %p2114_p12 }
 0x27c   : > { %v1340_v16 = vsel %vm492_vm7, %v1339_v29, %v1338_v6  ;;  %v917_v53 = vsel %vm477_vm2, %v916_v44, %v749_v38  ;;  %v918_v11 = vrot.slane %v751_v63, 6  ;;  %v922_v51 = vrot.slane %v753_v47, 4  ;;  %v1314_v6 = vld [vmem:[%s2555_s11 + $0x7] sm:$0x1]  ;;  %v1037_v38 = vld [vmem:[%s2555_s11 + $0x1a] sm:$0x1] }
 0x27d   : > { %v1342_v17 = vsel %vm495_vm8, %v1341_v14, %v1340_v16  ;;  %v924_v60 = vrot.slane %v754_v50, 3  ;;  %v926_v2 = vrot.slane %v755_v52, 2  ;;  %v928_v31 = vrot.slane %v756_v59, 1  ;;  %v1315_v16 = vld [vmem:[%s2555_s11 + $0xb] sm:$0x1] }
 0x27e   : > { %v919_v54 = vsel %vm480_vm3, %v918_v11, %v917_v53  ;;  %v1198_v29 = vrot.slane %v1032_v9, 7  ;;  %v1200_v14 = vrot.slane %v1033_v12, 6  ;;  %v1208_v52 = vrot.slane %v1037_v38, 2  ;;  %v1319_v59 = vld [vmem:[%s2555_s11 + $0x1b] sm:$0x1] }
 0x27f   : > { %v921_v61 = vsel %vm483_vm4, %v920_v48, %v919_v54 }
 0x280   : > { %v923_v57 = vsel %vm486_vm5, %v922_v51, %v921_v61  ;;  %v1038_v51 = vld [vmem:[%s2555_s11 + $0x1e] sm:$0x1] }
 0x283   : > { %v2686_v58 = vpop.eup %1997 }
 0x284   : > { %1882 = vmatmul.mubr.msk.f32.vlgmr.msra.gmra.mrb[0].mxu1 %vm595_vm10, %v2686_v58 }
 0x285   : > { %1885 = vmatpush3.xpose.msk.msra.mxu1 %vm422_vm0, %v800_v28  ;;  %1886 = vmatprep.mubr.msk.f32.mxu1 %vm2205_vm1, %v2204_v0 }
 0x286   : > { %1894 = vmatprep.subr.mxu1 %v2204_v0 }
 0x288   : > { %1887 = vmatmul.mubr.msk.f32.vlgmr.msra.gmra.mrb[2].mxu1 %vm422_vm0, %v778_v4  ;;  %v925_v4 = vsel %vm489_vm6, %v924_v60, %v923_v57  ;;  %v1210_v57 = vrot.slane %v1038_v51, 1 }
 0x289   : > { %1895 = vmatpush3.xpose.msk.msra.mxu1 %vm422_vm0, %v1082_v8  ;;  %1896 = vmatprep.mubr.msk.f32.mxu1 %vm2205_vm1, %v2204_v0  ;;  %v927_v5 = vsel %vm492_vm7, %v926_v2, %v925_v4  ;;  %v613_v8 = vsel %vm595_vm10, %v2686_v58, 0.0 }
 0x28a   : > { %1904 = vmatprep.subr.mxu1 %v2204_v0  ;;  %v929_v7 = vsel %vm495_vm8, %v928_v31, %v927_v5  ;;  %v1320_v5 = vld [vmem:[%s2555_s11 + $0x1f] sm:$0x1] }
 0x28b   : > { %1890 = vmatpush3.msra.mxu0 %v929_v7  ;;  %v1490_v7 = vrot.slane %v1319_v59, 2  ;;  %v1492_v12 = vrot.slane %v1320_v5, 1  ;;  %v1183_v5 = vld [vmem:[#allocation4 + $0x10] sm:$0xff] }
 0x28c   : > { %1897 = vmatmul.mubr.msk.f32.vlgmr.msra.gmra.mrb[4].mxu1 %vm422_vm0, %v1060_v13  ;;  %1899 = vmatprep.subr.mxu0 %v2204_v0  ;;  %v1034_v13 = vld [vmem:[%s2555_s11 + $0xe] sm:$0x1] }
 0x28d   : > { %1905 = vmatpush3.xpose.msk.msra.mxu1 %vm422_vm0, %v1364_v15  ;;  %1906 = vmatprep.mubr.msk.f32.mxu1 %vm2205_vm1, %v2204_v0  ;;  %v1199_v15 = vsel %vm477_vm2, %v1198_v29, %v1031_v39 }
 0x28e   : > { %v1201_v58 = vsel %vm480_vm3, %v1200_v14, %v1199_v15 }
 0x290   : > { %1907 = vmatmul.mubr.msk.f32.vlgmr.msra.gmra.mrb[6].mxu1 %vm422_vm0, %v1342_v17  ;;  %v1480_v17 = vrot.slane %v1314_v6, 7 }
 0x357   : > { %v2718_v18 = vpop.f32.mrb[0].mxu1 }
 0x358   : > { %v1883_v19 = vpop.f32.mrb[1].mxu1 }
 0x359   : > { %v1313_v19 = vld [vmem:[%s2555_s11 + $0x3] sm:$0x1] }
 0x35b   : > { %v871_v20 = vpop.f32.mrb[2].mxu1 }
 0x35c   : > { %v2721_v21 = vadd.f32 %v871_v20, %v2542_v56  ;;  %v1888_v22 = vpop.f32.mrb[3].mxu1  ;;  %v1035_v20 = vld [vmem:[%s2555_s11 + $0x12] sm:$0x1] }
 0x35d   : > { %v1202_v22 = vrot.slane %v1034_v13, 5 }
 0x35e   : > { %v877_v23 = vsel %vm595_vm10, %v2721_v21, -inf }
 0x35f   : > { %878 = vmax.xlane.f32.xlu1 %v877_v23  ;;  %v1153_v24 = vpop.f32.mrb[4].mxu1  ;;  %v1316_v23 = vld [vmem:[%s2555_s11 + $0xf] sm:$0x1] }
 0x360   : > { %v2726_v37 = vadd.f32 %v1153_v24, %v2542_v56  ;;  %v1898_v55 = vpop.f32.mrb[5].mxu1  ;;  %v1482_v24 = vrot.slane %v1315_v16, 6  ;;  %v1484_v43 = vrot.slane %v1316_v23, 5  ;;  %v601_v16 = vmul.f32 1.442695, %v600_v3 }
 0x362   : > { %v1159_v25 = vsel %vm595_vm10, %v2726_v37, -inf }
 0x363   : > { %1160 = vmax.xlane.f32.xlu1 %v1159_v25  ;;  %v1435_v26 = vpop.f32.mrb[6].mxu1  ;;  %v1481_v25 = vsel %vm477_vm2, %v1480_v17, %v1313_v19 }
 0x364   : > { %v2731_v27 = vadd.f32 %v1435_v26, %v2542_v56  ;;  %v1908_v28 = vpop.f32.mrb[7].mxu1  ;;  %v1483_v63 = vsel %vm480_vm3, %v1482_v24, %v1481_v25 }
 0x365   : > { %v1036_v28 = vld [vmem:[%s2555_s11 + $0x16] sm:$0x1]  ;;  %v1485_v48 = vsel %vm483_vm4, %v1484_v43, %v1483_v63 }
 0x366   : > { %v1441_v30 = vsel %vm595_vm10, %v2731_v27, -inf  ;;  %v1206_v46 = vrot.slane %v1036_v28, 3 }
 0x367   : > { %1442 = vmax.xlane.f32.xlu1 %v1441_v30  ;;  %v1204_v30 = vrot.slane %v1035_v20, 4 }
 0x3ec   : > { %v879_v10 = vpop.xlane.xlu1 %878 }
 0x3ed   : > { %v2738_v33 = vmax.f32 %v2735_v32, %v879_v10  ;;  %v1203_v10 = vsel %vm483_vm4, %v1202_v22, %v1201_v58  ;;  %v893_v58 = vld [vmem:[#allocation3 + $0x8] sm:$0xff] }
 0x3ee   : > { %v1205_v53 = vsel %vm486_vm5, %v1204_v30, %v1203_v10  ;;  %v1457_v30 = vld [vmem:[#allocation3 + $0x18] sm:$0xff] }
 0x3ef   : > { %v881_v56 = vsub.f32 %v2735_v32, %v2738_v33  ;;  %1006 = vst.msk [vmem:[#allocation2 + $0x8] sm:$0xff] %vm413_vm9, %v2738_v33  ;;  %886 = vperm.xlu1 %1996, %v2738_v33   ;;  %v1207_v60 = vsel %vm489_vm6, %v1206_v46, %v1205_v53  ;;  %v611_v33 = vld [vmem:[#allocation3] sm:$0xff] }
 0x3f0   : > { %v1161_v35 = vpop.xlane.xlu1 %1160  ;;  %v1209_v4 = vsel %vm492_vm7, %v1208_v52, %v1207_v60 }
 0x3f1   : > { %v2748_v36 = vmax.f32 %v2740_v34, %v1161_v35  ;;  %v1317_v35 = vld [vmem:[%s2555_s11 + $0x13] sm:$0x1]  ;;  %v1211_v9 = vsel %vm495_vm8, %v1210_v57, %v1209_v4  ;;  %v882_v19 = vmul.f32 1.442695, %v881_v56 }
 0x3f2   : > { %v1486_v11 = vrot.slane %v1317_v35, 4  ;;  %v619_v35 = vld [vmem:[#allocation4] sm:$0xff] }
 0x3f3   : > { %v1163_v42 = vsub.f32 %v2740_v34, %v2748_v36  ;;  %1288 = vst.msk [vmem:[#allocation2 + $0x10] sm:$0xff] %vm413_vm9, %v2748_v36  ;;  %1168 = vperm.xlu1 %1996, %v2748_v36  }
 0x3f4   : > { %v1443_v41 = vpop.xlane.xlu1 %1442 }
 0x3f5   : > { %v2760_v45 = vmax.f32 %v2750_v40, %v1443_v41 }
 0x3f7   : > { %v1445_v49 = vsub.f32 %v2750_v40, %v2760_v45  ;;  %1570 = vst.msk [vmem:[#allocation2 + $0x18] sm:$0xff] %vm413_vm9, %v2760_v45  ;;  %1450 = vperm.xlu1 %1996, %v2760_v45  }
 0x3f9   : > { %v1446_v20 = vmul.f32 1.442695, %v1445_v49 }
 0x41b   : > { %614 = vadd.xlane.f32.xlu1 %v613_v8 }
 0x46e   : > { %v887_v55 = vpop.permute.xlu1 %886 }
 0x46f   : > { %v889_v26 = vsub.f32 %v2721_v21, %v887_v55  ;;  %v1318_v21 = vld [vmem:[%s2555_s11 + $0x17] sm:$0x1] }
 0x470   : > { %v1488_v61 = vrot.slane %v1318_v21, 3  ;;  %v1175_v55 = vld [vmem:[#allocation3 + $0x10] sm:$0xff] }
 0x471   : > { %v890_v41 = vmul.f32 1.442695, %v889_v26 }
 0x472   : > { %v1169_v44 = vpop.permute.xlu1 %1168 }
 0x473   : > { %1999 = vpow2.f32 %v890_v41  ;;  %v1171_v47 = vsub.f32 %v2726_v37, %v1169_v44  ;;  %v1487_v37 = vsel %vm486_vm5, %v1486_v11, %v1485_v48 }
 0x474   : > { %v1489_v8 = vsel %vm489_vm6, %v1488_v61, %v1487_v37 }
 0x475   : > { %v1172_v50 = vmul.f32 1.442695, %v1171_v47  ;;  %v1491_v39 = vsel %vm492_vm7, %v1490_v7, %v1489_v8 }
 0x476   : > { %v1451_v54 = vpop.permute.xlu1 %1450  ;;  %v1493_v6 = vsel %vm495_vm8, %v1492_v12, %v1491_v39  ;;  %v1465_v39 = vld [vmem:[#allocation4 + $0x18] sm:$0xff] }
 0x477   : > { %2001 = vpow2.f32 %v1172_v50  ;;  %v1453_v2 = vsub.f32 %v2731_v27, %v1451_v54 }
 0x479   : > { %v1454_v31 = vmul.f32 1.442695, %v1453_v2 }
 0x47b   : > { %2003 = vpow2.f32 %v1454_v31  ;;  %v901_v31 = vld [vmem:[#allocation4 + $0x8] sm:$0xff] }
 0x47c   : > { %2005 = vpow2.f32 %v601_v16 }
 0x47d   : > { %v2000_v29 = vpop.eup %1999  ;;  %2007 = vpow2.f32 %v882_v19 }
 0x47e   : > { %1892 = vmatmul.mubr.msk.f32.vlgmr.msra.gmra.mrb[2].mxu0 %vm595_vm10, %v2000_v29  ;;  %v895_v27 = vsel %vm595_vm10, %v2000_v29, 0.0  ;;  %2009 = vpow2.f32 %v1446_v20 }
 0x47f   : > { %896 = vadd.xlane.f32.xlu0 %v895_v27  ;;  %1900 = vmatpush3.msra.mxu0 %v1211_v9 }
 0x480   : > { %1901 = vmatprep.mubr.msk.f32.mxu0 %vm2205_vm1, %v2204_v0  ;;  %1909 = vmatprep.subr.mxu0 %v2204_v0 }
 0x481   : > { %v2002_v13 = vpop.eup %2001 }
 0x482   : > { %1902 = vmatmul.mubr.msk.f32.vlgmr.msra.gmra.mrb[4].mxu0 %vm595_vm10, %v2002_v13  ;;  %v1177_v14 = vsel %vm595_vm10, %v2002_v13, 0.0 }
 0x483   : > { %1178 = vadd.xlane.f32.xlu1 %v1177_v14  ;;  %1910 = vmatpush3.msra.mxu0 %v1493_v6 }
 0x484   : > { %1911 = vmatprep.mubr.msk.f32.mxu0 %vm2205_vm1, %v2204_v0  ;;  %v1164_v0 = vmul.f32 1.442695, %v1163_v42 }
 0x485   : > { %v2004_v15 = vpop.eup %2003 }
 0x486   : > { %1912 = vmatmul.mubr.msk.f32.vlgmr.msra.gmra.mrb[6].mxu0 %vm595_vm10, %v2004_v15  ;;  %v1459_v17 = vsel %vm595_vm10, %v2004_v15, 0.0  ;;  %2011 = vpow2.f32 %v1164_v0  ;;  %v2006_v62 = vpop.eup %2005 }
 0x487   : > { %1460 = vadd.xlane.f32.xlu1 %v1459_v17  ;;  %v2008_v1 = vpop.eup %2007  ;;  %v612_v56 = vmul.f32 %v2006_v62, %v611_v33 }
 0x488   : > { %v2010_v3 = vpop.eup %2009  ;;  %v894_v23 = vmul.f32 %v2008_v1, %v893_v58 }
 0x489   : > { %v1458_v43 = vmul.f32 %v2010_v3, %v1457_v30 }
 0x490   : > { %v2012_v32 = vpop.eup %2011 }
 0x491   : > { %v1176_v26 = vmul.f32 %v2012_v32, %v1175_v55 }
 0x495   : > { %622 = vperm.xlu0 %1995, %v2006_v62  }
 0x498   : > { %904 = vperm.xlu1 %1996, %v2008_v1  }
 0x499   : > { %1468 = vperm.xlu0 %1995, %v2010_v3  }
 0x49c   : > { %1186 = vperm.xlu1 %1996, %v2012_v32  }
 0x4a8   : > { %v615_v22 = vpop.xlane.xlu1 %614 }
 0x4a9   : > { %v616_v40 = vadd.f32 %v615_v22, %v612_v56 }
 0x4ab   : > { %618 = vst.msk [vmem:[#allocation3] sm:$0xff] %vm413_vm9, %v616_v40 }
 0x4b2   : > { %v1574_v45 = vld [vmem:[#allocation3] sm:$0xff] }
 0x4b3   : > { %2013 = vrcp.f32 %v1574_v45 }
 0x4bd   : > { %v2014_v34 = vpop.eup %2013 }
 0x4be   : > { %v1576_v36 = vmul.f32 %v2014_v34, %v1574_v45 }
 0x4c0   : > { %v1577_v42 = vsub.f32 2.0, %v1576_v36 }
 0x4c2   : > { %v1578_v49 = vmul.f32 %v2014_v34, %v1577_v42 }
 0x4c4   : > { %1582 = vperm.xlu1 %1996, %v1578_v49  }
 0x50c   : > { %v897_v24 = vpop.xlane.xlu0 %896 }
 0x50d   : > { %v898_v25 = vadd.f32 %v897_v24, %v894_v23 }
 0x50f   : > { %899 = vst.msk [vmem:[#allocation3 + $0x8] sm:$0xff] %vm413_vm9, %v898_v25 }
 0x510   : > { %v1179_v28 = vpop.xlane.xlu1 %1178 }
 0x511   : > { %v1180_v10 = vadd.f32 %v1179_v28, %v1176_v26 }
 0x513   : > { %1181 = vst.msk [vmem:[#allocation3 + $0x10] sm:$0xff] %vm413_vm9, %v1180_v10 }
 0x514   : > { %v1461_v41 = vpop.xlane.xlu1 %1460  ;;  %v623_v63 = vpop.permute.xlu0 %622 }
 0x515   : > { %v1462_v44 = vadd.f32 %v1461_v41, %v1458_v43  ;;  %v625_v38 = vmul.f32 %v623_v63, %v619_v35 }
 0x516   : > { %v1586_v46 = vld [vmem:[#allocation3 + $0x8] sm:$0xff] }
 0x517   : > { %1463 = vst.msk [vmem:[#allocation3 + $0x18] sm:$0xff] %vm413_vm9, %v1462_v44  ;;  %v722_v47 = vadd.f32 %v2718_v18, %v625_v38  ;;  %2015 = vrcp.f32 %v1586_v46 }
 0x518   : > { %v905_v57 = vpop.permute.xlu1 %904  ;;  %v1469_v27 = vpop.permute.xlu0 %1468 }
 0x519   : > { %723 = vst.msk [vmem:[#allocation4] sm:$0xff] %vm422_vm0, %v722_v47  ;;  %v907_v4 = vmul.f32 %v905_v57, %v901_v31  ;;  %v1471_v15 = vmul.f32 %v1469_v27, %v1465_v39 }
 0x51a   : > { %v1598_v53 = vld [vmem:[#allocation3 + $0x10] sm:$0xff] }
 0x51b   : > { %2017 = vrcp.f32 %v1598_v53 }
 0x51c   : > { %v1187_v7 = vpop.permute.xlu1 %1186 }
 0x51d   : > { %v1189_v29 = vmul.f32 %v1187_v7, %v1183_v5 }
 0x51e   : > { %v1610_v21 = vld [vmem:[#allocation3 + $0x18] sm:$0xff] }
 0x51f   : > { %2019 = vrcp.f32 %v1610_v21 }
 0x520   : > { %v1579_v45 = vld [vmem:[#allocation4] sm:$0xff] }
 0x521   : > { %v2016_v11 = vpop.eup %2015 }
 0x522   : > { %v1588_v48 = vmul.f32 %v2016_v11, %v1586_v46 }
 0x524   : > { %v1589_v50 = vsub.f32 2.0, %v1588_v48 }
 0x525   : > { %v2018_v51 = vpop.eup %2017 }
 0x526   : > { %v1590_v52 = vmul.f32 %v2016_v11, %v1589_v50  ;;  %v1600_v54 = vmul.f32 %v2018_v51, %v1598_v53 }
 0x528   : > { %1594 = vperm.xlu0 %1995, %v1590_v52   ;;  %v1601_v60 = vsub.f32 2.0, %v1600_v54 }
 0x529   : > { %v2020_v59 = vpop.eup %2019 }
 0x52a   : > { %v1602_v61 = vmul.f32 %v2018_v51, %v1601_v60  ;;  %v1612_v2 = vmul.f32 %v2020_v59, %v1610_v21 }
 0x52c   : > { %1606 = vperm.xlu1 %1996, %v1602_v61   ;;  %v1613_v18 = vsub.f32 2.0, %v1612_v2 }
 0x52e   : > { %v1614_v37 = vmul.f32 %v2020_v59, %v1613_v18 }
 0x530   : > { %1618 = vperm.xlu0 %1995, %v1614_v37  }
 0x543   : > { %v1583_v20 = vpop.permute.xlu1 %1582 }
 0x544   : > { %v1585_v36 = vmul.f32 %v1583_v20, %v1579_v45 }
 0x551   : > { %v1000_v8 = vpop.f32.mrb[2].mxu0 }
 0x552   : > { %v1004_v9 = vadd.f32 %v1000_v8, %v907_v4  ;;  %v1893_v12 = vpop.f32.mrb[3].mxu0 }
 0x554   : > { %1005 = vst.msk [vmem:[#allocation4 + $0x8] sm:$0xff] %vm422_vm0, %v1004_v9 }
 0x555   : > { %v1282_v6 = vpop.f32.mrb[4].mxu0 }
 0x556   : > { %v1286_v13 = vadd.f32 %v1282_v6, %v1189_v29  ;;  %v1903_v14 = vpop.f32.mrb[5].mxu0 }
 0x558   : > { %1287 = vst.msk [vmem:[#allocation4 + $0x10] sm:$0xff] %vm422_vm0, %v1286_v13 }
 0x559   : > { %v1564_v16 = vpop.f32.mrb[6].mxu0 }
 0x55a   : > { %v1568_v17 = vadd.f32 %v1564_v16, %v1471_v15  ;;  %v1913_v19 = vpop.f32.mrb[7].mxu0 }
 0x55b   : > { %v1591_v0 = vld [vmem:[#allocation4 + $0x8] sm:$0xff] }
 0x55c   : > { %1569 = vst.msk [vmem:[#allocation4 + $0x18] sm:$0xff] %vm422_vm0, %v1568_v17 }
 0x55f   : > { %v1603_v3 = vld [vmem:[#allocation4 + $0x10] sm:$0xff] }
 0x563   : > { %v1615_v56 = vld [vmem:[#allocation4 + $0x18] sm:$0xff] }
 0x5a7   : > { %v1595_v62 = vpop.permute.xlu0 %1594 }
 0x5a8   : > { %v1597_v1 = vmul.f32 %v1595_v62, %v1591_v0 }
 0x5aa   : > { %1623 = vrot.lane.b32.xlu1 %v1597_v1, %s2208_s28 }
 0x5ab   : > { %v1607_v32 = vpop.permute.xlu1 %1606 }
 0x5ac   : > { %v1609_v33 = vmul.f32 %v1607_v32, %v1603_v3 }
 0x5ae   : > { %1627 = vrot.lane.b32.xlu0 %v1609_v33, %s2209_s16 }
 0x5af   : > { %v1619_v22 = vpop.permute.xlu0 %1618 }
 0x5b0   : > { %v1621_v40 = vmul.f32 %v1619_v22, %v1615_v56 }
 0x5b2   : > { %1631 = vrot.lane.b32.xlu1 %v1621_v40, %s2210_s8 }
 0x61c   : > { %v1624_v34 = vpop.permute.xlu1 %1623 }
 0x61d   : > { %v1634_v49 = vsel %vm422_vm0, %v1585_v36, %v1624_v34 }
 0x620   : > { %v1628_v42 = vpop.permute.xlu0 %1627 }
 0x621   : > { %v1636_v58 = vsel %vm1635_vm11, %v1634_v49, %v1628_v42 }
 0x624   : > { %v1632_v23 = vpop.permute.xlu1 %1631 }
 0x625   : > { %v1638_v24 = vsel %vm1637_vm12, %v1636_v58, %v1632_v23 }
 0x626   : > { %1639 = vst [vmem:[%s392_s10] sm:$0xff] %v1638_v24 }
 0x627   : > { %2124 = shalt.err (!%p2121_p11)
}
 0x628   : > { %s2125_s29 = scalar_lea.hbm %s2854_s14, 128  ;;  %s2129_s7 = scalar_lea.hbm %s2908_s5, 256 }
 0x629   : > { %p2126_p2 = scmp.ne.s32.totalorder %s2854_s14, %s2125_s29  ;;  %p2130_p4 = scmp.lt.u32.totalorder %s2854_s14, %s2908_s5 }
 0x62a   : > { %p2131_p3 = scmp.lt.u32.totalorder %s2129_s7, %s2125_s29  ;;  %p2133_p10 = scmp.lt.u32.totalorder %s2125_s29, %s2854_s14 }
 0x62b   : > { %p2127_p5 = pnand %p2126_p2, %p2942_p8 }
 0x62c   : > { %p2132_p0 = por %p2131_p3, %p2130_p4 }
 0x62d   : > { %p2128_p7 = pneg %p2127_p5 }
 0x62e   : > { %p2134_p9 = por %p2133_p10, %p2132_p0 }
 0x630   : > { %p2135_p12 = pnand %p2134_p9, %p2128_p7 }
 0x632   : > { %2138 = shalt.err (!%p2135_p12)
}
 0x633   : > { %1920 = dma.vmem_to_hbm [thread:$0]  (%p2942_p8), %s2856_s15, 128, %s2854_s14, %s1641_s21  }
 0x634 PF: > { %s2943_s11 = sld [smem:[#allocation19_spill]]  ;;  %s2944_s28 = sld [smem:[#allocation16_spill]] }
 0x635   : > { %s1667_s16 = sand.u32 1, %s2177_s18  }
 0x636   : > { %s1668_s8 = scalar_lea.sflag [#allocation7], %s1667_s16 }
 0x63a   : > { %p2945_p1 = scmp.ne.s32.totalorder %s2943_s11, 0  ;;  %p2946_p6 = scmp.ge.s32.totalorder %s2944_s28, 2 }
 0x63c   : > { %p1933_p13 = pnand %p2946_p6, %p2945_p1 }
 0x63e   : > { %2172 = dma.done.wait (!%p1933_p13), %s1668_s8, 128  }
 0x63f   : > { %2174 = vsyncadd (!%p1933_p13), %s1668_s8, 4294967168  ;;  %s24_s23 = sadd.s32 1, %s2944_s28   ;;  %s2947_s6 = sld [smem:[#allocation18_spill]] }
 0x640   : > { %p21_p11 = scmp.ge.s32.totalorder %s24_s23, 4   ;;  %s2948_s21 = sld [smem:[#allocation15_spill]] }
 0x641   : > { %s2949_s22 = sld [smem:[#allocation17_spill]]  ;;  %s2950_s18 = smov %s2181_s19 }
 0x642   : > { %s2951_s19 = smov %s2185_s20  ;;  %23 = sbr.rel (!%p21_p11) target bundleno = 10 (0xa), region = 132 }
 0x645   : > { %s2952_s20 = smov %s2947_s6 }
 0x649   :  { %1673 = vsyncpa [#allocation6], 1 }
 0x64a   :  { %1675 = vsyncpa [#allocation6 + $0x1], 1 }
 0x64b   :  { %1676 = vsyncpa [#allocation9], 1 }
 0x64c   :  { %1678 = vsyncpa [#allocation9 + $0x1], 1 }
 0x64d   :  { %1679 = vsyncpa [#allocation7], 1 }
 0x64e   :  { %1681 = vsyncpa [#allocation7 + $0x1], 1 }

</bundles_post_ra>
